<compile_context>
chip_gen: v5e
topology: v5e:2x2
jax: 0.10.0
libtpu: 0.0.40
codegen_flags: <defaults>
</compile_context>

<pallas_src>
import functools

import jax
import jax.numpy as jnp
from jax.experimental import pallas as pl
from jax.experimental.pallas import tpu as pltpu


def _round_up(v, m):
    return ((v + m - 1) // m) * m


# ----------------------------------------------------------------------------
# Fused Pallas kernel: grid = (layer/phase, node-row tile)
# ----------------------------------------------------------------------------
def fused_gcn_kernel(a_ref, x_ref, w1_ref, w2_ref, w3_ref,
                     b1_ref, b2_ref, b3_ref, o_ref,
                     t2_ref, t3_ref, *, tm, n_classes):
    l = pl.program_id(0)            # phase / layer index (0, 1, 2) -- sequential
    i = pl.program_id(1)            # node-row tile index
    row = pl.multiple_of(i * tm, tm)
    a_tile = a_ref[pl.ds(row, tm), :]          # (tm, n_pad) bf16, A is VMEM-resident

    @pl.when(l == 0)
    def _():
        # Layer 1: aggregate the NARROW X first ((A@X)@W1, Fin_p=128 < H1p=256),
        # then fuse layer 2's row-local transform so layer 2 aggregates at H2p.
        agg = jnp.dot(a_tile, x_ref[...], preferred_element_type=jnp.float32)
        y1 = jnp.dot(agg.astype(jnp.bfloat16), w1_ref[...],
                     preferred_element_type=jnp.float32) + b1_ref[...]
        h1 = jnp.maximum(y1, 0.0).astype(jnp.bfloat16)                 # (tm, H1p)
        t2 = jnp.dot(h1, w2_ref[...], preferred_element_type=jnp.float32)
        t2_ref[pl.ds(row, tm), :] = t2.astype(t2_ref.dtype)            # (tm, H2p)

    @pl.when(l == 1)
    def _():
        # Layer 2: aggregate pre-transformed T2 (narrow), fuse layer 3 transform.
        y2 = (jnp.dot(a_tile, t2_ref[...], preferred_element_type=jnp.float32)
              + b2_ref[...])
        h2 = jnp.maximum(y2, 0.0).astype(jnp.bfloat16)                 # (tm, H2p)
        t3 = jnp.dot(h2, w3_ref[...], preferred_element_type=jnp.float32)
        t3_ref[pl.ds(row, tm), :] = t3.astype(t3_ref.dtype)            # (tm, Cp)

    @pl.when(l == 2)
    def _():
        # Layer 3: aggregate T3, bias, masked lane-dense log_softmax, write out.
        y3 = (jnp.dot(a_tile, t3_ref[...], preferred_element_type=jnp.float32)
              + b3_ref[...])
        col = jax.lax.broadcasted_iota(jnp.int32, y3.shape, 1)
        logits = jnp.where(col < n_classes, y3, -jnp.inf)
        m = jnp.max(logits, axis=1, keepdims=True)
        s = logits - m
        lse = jnp.log(jnp.sum(jnp.exp(s), axis=1, keepdims=True))
        o_ref[...] = (s - lse).astype(o_ref.dtype)


# ----------------------------------------------------------------------------
# Wrapper: per-layer lane-dense padding + pallas_call
# ----------------------------------------------------------------------------
def pyg_net_forward(x, a_hat, params, *, tm=128):
    # tm=128 is v5e-friendly; bump to 256 on v6e/v7x (256-wide MXU passes),
    # VMEM permitting.
    n, f_in = x.shape
    (w1, b1), (w2, b2), (w3, b3) = params
    h1, h2, c = w1.shape[1], w2.shape[1], w3.shape[1]

    fin_p = _round_up(f_in, 128)
    h1_p = _round_up(h1, 128)
    h2_p = _round_up(h2, 128)
    c_p = _round_up(c, 128)
    n_pad = _round_up(n, tm)

    def pad2(m, r, co, dtype):
        out = jnp.zeros((r, co), dtype)
        return out.at[:m.shape[0], :m.shape[1]].set(m.astype(dtype))

    a_p = pad2(a_hat, n_pad, n_pad, jnp.bfloat16)
    x_p = pad2(x, n_pad, fin_p, jnp.bfloat16)
    w1_p = pad2(w1, fin_p, h1_p, jnp.bfloat16)
    w2_p = pad2(w2, h1_p, h2_p, jnp.bfloat16)
    w3_p = pad2(w3, h2_p, c_p, jnp.bfloat16)
    b1_p = jnp.zeros((1, h1_p), jnp.float32).at[0, :h1].set(b1)
    b2_p = jnp.zeros((1, h2_p), jnp.float32).at[0, :h2].set(b2)
    b3_p = jnp.zeros((1, c_p), jnp.float32).at[0, :c].set(b3)

    # Explicit VMEM budget: resident A/X/W/b + two activation scratches
    # + double-buffered output tile, with headroom (clamped to v7x's 64 MiB).
    vmem_bytes = (
        (a_p.size + x_p.size + w1_p.size + w2_p.size + w3_p.size) * 2
        + (b1_p.size + b2_p.size + b3_p.size) * 4
        + (n_pad * h2_p + n_pad * c_p) * 2
        + 2 * tm * c_p * 4)
    vmem_limit = int(min(64 << 20, max(32 << 20, 2 * vmem_bytes)))

    grid = (3, n_pad // tm)
    out = pl.pallas_call(
        functools.partial(fused_gcn_kernel, tm=tm, n_classes=c),
        out_shape=jax.ShapeDtypeStruct((n_pad, c_p), jnp.float32),
        grid_spec=pltpu.PrefetchScalarGridSpec(
            num_scalar_prefetch=0,
            grid=grid,
            in_specs=[
                pl.BlockSpec((n_pad, n_pad), lambda l, i: (0, 0)),    # A_hat (resident)
                pl.BlockSpec((n_pad, fin_p), lambda l, i: (0, 0)),    # X (resident)
                pl.BlockSpec((fin_p, h1_p), lambda l, i: (0, 0)),     # W1
                pl.BlockSpec((h1_p, h2_p), lambda l, i: (0, 0)),      # W2
                pl.BlockSpec((h2_p, c_p), lambda l, i: (0, 0)),       # W3
                pl.BlockSpec((1, h1_p), lambda l, i: (0, 0)),         # b1
                pl.BlockSpec((1, h2_p), lambda l, i: (0, 0)),         # b2
                pl.BlockSpec((1, c_p), lambda l, i: (0, 0)),          # b3
            ],
            # Output block only tracks the row tile on the final phase, so
            # phases 0/1 never trigger an HBM writeback of uninitialized data.
            out_specs=pl.BlockSpec(
                (tm, c_p), lambda l, i: (jnp.where(l == 2, i, 0), 0)),
            scratch_shapes=[
                pltpu.VMEM((n_pad, h2_p), jnp.bfloat16),   # T2 = relu(L1) @ W2
                pltpu.VMEM((n_pad, c_p), jnp.bfloat16),    # T3 = relu(L2) @ W3
            ],
        ),
        compiler_params=pltpu.CompilerParams(
            # Layer axis is a true dependency; row axis must stay sequential
            # because layer l+1 reads the full VMEM activation scratch written
            # by all row tiles of layer l (and the out-block pinning relies on
            # sequential ordering).
            dimension_semantics=("arbitrary", "arbitrary"),
            vmem_limit_bytes=vmem_limit,
        ),
    )(a_p, x_p, w1_p, w2_p, w3_p, b1_p, b2_p, b3_p)
    return out[:n, :c]


# ----------------------------------------------------------------------------
# Graph / parameter setup (glue, plain JAX)
# ----------------------------------------------------------------------------
def build_normalized_adjacency(edge_index, n):
    a = jnp.zeros((n, n), jnp.float32)
    a = a.at[edge_index[0], edge_index[1]].set(1.0)
    a = a + jnp.eye(n, dtype=jnp.float32)            # add self-loops
    deg = a.sum(axis=1)
    d_inv_sqrt = 1.0 / jnp.sqrt(deg)
    return d_inv_sqrt[:, None] * a * d_inv_sqrt[None, :]


def glorot(key, f_in, f_out):
    lim = jnp.sqrt(6.0 / (f_in + f_out))
    return jax.random.uniform(key, (f_in, f_out), jnp.float32, -lim, lim)


def ref_forward(x, a_hat, params):
    (w1, b1), (w2, b2), (w3, b3) = params
    h = jnp.maximum(a_hat @ (x @ w1) + b1, 0.0)
    h = jnp.maximum(a_hat @ (h @ w2) + b2, 0.0)
    h = a_hat @ (h @ w3) + b3
    return jax.nn.log_softmax(h, axis=1)


if __name__ == "__main__":
    # Small stand-in shapes for Cora (1433 features / 7 classes):
    N, F_IN, H1, H2, C = 256, 64, 256, 32, 7

    key = jax.random.PRNGKey(0)
    k_x, k_w1, k_w2, k_w3 = jax.random.split(key, 4)

    # Node features
    x = jax.random.normal(k_x, (N, F_IN), jnp.float32)

    # Deterministic synthetic edge_index: undirected ring graph
    src = jnp.arange(N, dtype=jnp.int32)
    dst = (src + 1) % N
    edge_index = jnp.stack(
        [jnp.concatenate([src, dst]), jnp.concatenate([dst, src])], axis=0)
    a_hat = build_normalized_adjacency(edge_index, N)

    # GCNConv params (glorot weights, zero bias -- matches PyG reset_parameters)
    params = [
        (glorot(k_w1, F_IN, H1), jnp.zeros((H1,), jnp.float32)),
        (glorot(k_w2, H1, H2), jnp.zeros((H2,), jnp.float32)),
        (glorot(k_w3, H2, C), jnp.zeros((C,), jnp.float32)),
    ]

    forward = jax.jit(pyg_net_forward)
    out = jax.block_until_ready(forward(x, a_hat, params))

    ref = ref_forward(x, a_hat, params)
    assert out.shape == (N, C)
    assert bool(jnp.all(jnp.isfinite(out)))
    # bf16 MXU operands -> loosened tolerance vs the f32 reference.
    max_err = float(jnp.max(jnp.abs(out - ref)))
    assert jnp.allclose(out, ref, atol=5e-2, rtol=5e-2), f"max_err={max_err}"

    print("KERNEL_OK")
</pallas_src>

<mosaic_0001>
module attributes {stable_mosaic.version = 11 : i64} {
  func.func @fused_gcn_kernel(%arg0: i32, %arg1: i32, %arg2: memref<256x256xbf16, #tpu.memory_space<vmem>>, %arg3: memref<256x128xbf16, #tpu.memory_space<vmem>>, %arg4: memref<128x256xbf16, #tpu.memory_space<vmem>>, %arg5: memref<256x128xbf16, #tpu.memory_space<vmem>>, %arg6: memref<128x128xbf16, #tpu.memory_space<vmem>>, %arg7: memref<1x256xf32, #tpu.memory_space<vmem>>, %arg8: memref<1x128xf32, #tpu.memory_space<vmem>>, %arg9: memref<1x128xf32, #tpu.memory_space<vmem>>, %arg10: memref<128x128xf32, #tpu.memory_space<vmem>>, %arg11: memref<256x128xbf16, #tpu.memory_space<vmem>>, %arg12: memref<256x128xbf16, #tpu.memory_space<vmem>>) attributes {dimension_semantics = [#tpu.dimension_semantics<arbitrary>, #tpu.dimension_semantics<arbitrary>], iteration_bounds = array<i64: 3, 2>, scalar_prefetch = 0 : i64, scratch_operands = 2 : i64, tpu.core_type = #tpu.core_type<tc>, window_params = [{pipeline_mode = #tpu.pipeline_mode<synchronous>, transform_indices = @transform_0, window_bounds = array<i64: 256, 256>}, {pipeline_mode = #tpu.pipeline_mode<synchronous>, transform_indices = @transform_1, window_bounds = array<i64: 256, 128>}, {pipeline_mode = #tpu.pipeline_mode<synchronous>, transform_indices = @transform_2, window_bounds = array<i64: 128, 256>}, {pipeline_mode = #tpu.pipeline_mode<synchronous>, transform_indices = @transform_3, window_bounds = array<i64: 256, 128>}, {pipeline_mode = #tpu.pipeline_mode<synchronous>, transform_indices = @transform_4, window_bounds = array<i64: 128, 128>}, {pipeline_mode = #tpu.pipeline_mode<synchronous>, transform_indices = @transform_5, window_bounds = array<i64: 1, 256>}, {pipeline_mode = #tpu.pipeline_mode<synchronous>, transform_indices = @transform_6, window_bounds = array<i64: 1, 128>}, {pipeline_mode = #tpu.pipeline_mode<synchronous>, transform_indices = @transform_7, window_bounds = array<i64: 1, 128>}, {transform_indices = @transform_8, window_bounds = array<i64: 128, 128>}]} {
    %c128_i32 = arith.constant 128 : i32
    %0 = arith.muli %arg1, %c128_i32 : i32
    %1 = tpu.assume_multiple %0, 128 : i32
    %2 = arith.index_cast %1 : i32 to index
    %c0 = arith.constant 0 : index
    %3 = vector.load %arg2[%2, %c0] : memref<256x256xbf16, #tpu.memory_space<vmem>>, vector<128x256xbf16>
    %c0_i32 = arith.constant 0 : i32
    %4 = arith.cmpi eq, %arg0, %c0_i32 : i32
    %5 = arith.extui %4 : i1 to i32
    %c0_i32_0 = arith.constant 0 : i32
    %6 = arith.cmpi ne, %5, %c0_i32_0 : i32
    scf.if %6 {
      %c0_3 = arith.constant 0 : index
      %c0_4 = arith.constant 0 : index
      %13 = vector.load %arg3[%c0_3, %c0_4] : memref<256x128xbf16, #tpu.memory_space<vmem>>, vector<256x128xbf16>
      %cst = arith.constant dense<0.000000e+00> : vector<128x128xf32>
      %14 = tpu.matmul %3, %13, %cst {dimension_numbers = #tpu.dot_dimension_numbers<[1], [0], [0], [1], [0, 0, 1, 1], [], []>} : vector<128x256xbf16>, vector<256x128xbf16>, vector<128x128xf32> -> vector<128x128xf32>
      %15 = arith.truncf %14 : vector<128x128xf32> to vector<128x128xbf16>
      %c0_5 = arith.constant 0 : index
      %c0_6 = arith.constant 0 : index
      %16 = vector.load %arg4[%c0_5, %c0_6] : memref<128x256xbf16, #tpu.memory_space<vmem>>, vector<128x256xbf16>
      %cst_7 = arith.constant dense<0.000000e+00> : vector<128x256xf32>
      %17 = tpu.matmul %15, %16, %cst_7 {dimension_numbers = #tpu.dot_dimension_numbers<[1], [0], [0], [1], [0, 0, 1, 1], [], []>} : vector<128x128xbf16>, vector<128x256xbf16>, vector<128x256xf32> -> vector<128x256xf32>
      %c0_8 = arith.constant 0 : index
      %c0_9 = arith.constant 0 : index
      %18 = vector.load %arg7[%c0_8, %c0_9] : memref<1x256xf32, #tpu.memory_space<vmem>>, vector<1x256xf32>
      %19 = vector.broadcast %18 : vector<1x256xf32> to vector<128x256xf32>
      %20 = arith.addf %17, %19 : vector<128x256xf32>
      %cst_10 = arith.constant 0.000000e+00 : f32
      %21 = vector.broadcast %cst_10 : f32 to vector<128x256xf32>
      %22 = arith.maximumf %20, %21 : vector<128x256xf32>
      %23 = arith.truncf %22 : vector<128x256xf32> to vector<128x256xbf16>
      %c0_11 = arith.constant 0 : index
      %c0_12 = arith.constant 0 : index
      %24 = vector.load %arg5[%c0_11, %c0_12] : memref<256x128xbf16, #tpu.memory_space<vmem>>, vector<256x128xbf16>
      %cst_13 = arith.constant dense<0.000000e+00> : vector<128x128xf32>
      %25 = tpu.matmul %23, %24, %cst_13 {dimension_numbers = #tpu.dot_dimension_numbers<[1], [0], [0], [1], [0, 0, 1, 1], [], []>} : vector<128x256xbf16>, vector<256x128xbf16>, vector<128x128xf32> -> vector<128x128xf32>
      %26 = arith.truncf %25 : vector<128x128xf32> to vector<128x128xbf16>
      %27 = arith.index_cast %1 : i32 to index
      %c0_14 = arith.constant 0 : index
      %28 = vector.load %arg11[%27, %c0_14] : memref<256x128xbf16, #tpu.memory_space<vmem>>, vector<128x128xbf16>
      tpu.vector_store %arg11[%27, %c0_14], %26 {strides = array<i32>} : memref<256x128xbf16, #tpu.memory_space<vmem>>, vector<128x128xbf16>,
    } else {
    }
    %c1_i32 = arith.constant 1 : i32
    %7 = arith.cmpi eq, %arg0, %c1_i32 : i32
    %8 = arith.extui %7 : i1 to i32
    %c0_i32_1 = arith.constant 0 : i32
    %9 = arith.cmpi ne, %8, %c0_i32_1 : i32
    scf.if %9 {
      %c0_3 = arith.constant 0 : index
      %c0_4 = arith.constant 0 : index
      %13 = vector.load %arg11[%c0_3, %c0_4] : memref<256x128xbf16, #tpu.memory_space<vmem>>, vector<256x128xbf16>
      %cst = arith.constant dense<0.000000e+00> : vector<128x128xf32>
      %14 = tpu.matmul %3, %13, %cst {dimension_numbers = #tpu.dot_dimension_numbers<[1], [0], [0], [1], [0, 0, 1, 1], [], []>} : vector<128x256xbf16>, vector<256x128xbf16>, vector<128x128xf32> -> vector<128x128xf32>
      %c0_5 = arith.constant 0 : index
      %c0_6 = arith.constant 0 : index
      %15 = vector.load %arg8[%c0_5, %c0_6] : memref<1x128xf32, #tpu.memory_space<vmem>>, vector<1x128xf32>
      %16 = vector.broadcast %15 : vector<1x128xf32> to vector<128x128xf32>
      %17 = arith.addf %14, %16 : vector<128x128xf32>
      %cst_7 = arith.constant 0.000000e+00 : f32
      %18 = vector.broadcast %cst_7 : f32 to vector<128x128xf32>
      %19 = arith.maximumf %17, %18 : vector<128x128xf32>
      %20 = arith.truncf %19 : vector<128x128xf32> to vector<128x128xbf16>
      %c0_8 = arith.constant 0 : index
      %c0_9 = arith.constant 0 : index
      %21 = vector.load %arg6[%c0_8, %c0_9] : memref<128x128xbf16, #tpu.memory_space<vmem>>, vector<128x128xbf16>
      %cst_10 = arith.constant dense<0.000000e+00> : vector<128x128xf32>
      %22 = tpu.matmul %20, %21, %cst_10 {dimension_numbers = #tpu.dot_dimension_numbers<[1], [0], [0], [1], [0, 0, 1, 1], [], []>} : vector<128x128xbf16>, vector<128x128xbf16>, vector<128x128xf32> -> vector<128x128xf32>
      %23 = arith.truncf %22 : vector<128x128xf32> to vector<128x128xbf16>
      %24 = arith.index_cast %1 : i32 to index
      %c0_11 = arith.constant 0 : index
      %25 = vector.load %arg12[%24, %c0_11] : memref<256x128xbf16, #tpu.memory_space<vmem>>, vector<128x128xbf16>
      tpu.vector_store %arg12[%24, %c0_11], %23 {strides = array<i32>} : memref<256x128xbf16, #tpu.memory_space<vmem>>, vector<128x128xbf16>,
    } else {
    }
    %c2_i32 = arith.constant 2 : i32
    %10 = arith.cmpi eq, %arg0, %c2_i32 : i32
    %11 = arith.extui %10 : i1 to i32
    %c0_i32_2 = arith.constant 0 : i32
    %12 = arith.cmpi ne, %11, %c0_i32_2 : i32
    scf.if %12 {
      %c0_3 = arith.constant 0 : index
      %c0_4 = arith.constant 0 : index
      %13 = vector.load %arg12[%c0_3, %c0_4] : memref<256x128xbf16, #tpu.memory_space<vmem>>, vector<256x128xbf16>
      %cst = arith.constant dense<0.000000e+00> : vector<128x128xf32>
      %14 = tpu.matmul %3, %13, %cst {dimension_numbers = #tpu.dot_dimension_numbers<[1], [0], [0], [1], [0, 0, 1, 1], [], []>} : vector<128x256xbf16>, vector<256x128xbf16>, vector<128x128xf32> -> vector<128x128xf32>
      %c0_5 = arith.constant 0 : index
      %c0_6 = arith.constant 0 : index
      %15 = vector.load %arg9[%c0_5, %c0_6] : memref<1x128xf32, #tpu.memory_space<vmem>>, vector<1x128xf32>
      %16 = vector.broadcast %15 : vector<1x128xf32> to vector<128x128xf32>
      %17 = arith.addf %14, %16 : vector<128x128xf32>
      %18 = tpu.iota {dimensions = array<i32: 1>} : vector<128x128xi32>
      %c7_i32 = arith.constant 7 : i32
      %19 = vector.broadcast %c7_i32 : i32 to vector<128x128xi32>
      %20 = arith.cmpi slt, %18, %19 : vector<128x128xi32>
      %cst_7 = arith.constant 0xFF800000 : f32
      %21 = vector.broadcast %cst_7 : f32 to vector<128x128xf32>
      %22 = arith.select %20, %17, %21 : vector<128x128xi1>, vector<128x128xf32>
      %cst_8 = arith.constant dense<0xFF800000> : vector<128xf32>
      %23 = vector.multi_reduction <maximumf>, %22, %cst_8 [1] : vector<128x128xf32> to vector<128xf32>
      %24 = vector.shape_cast %23 : vector<128xf32> to vector<128x1xf32>
      %25 = vector.broadcast %24 : vector<128x1xf32> to vector<128x128xf32>
      %26 = arith.subf %22, %25 : vector<128x128xf32>
      %27 = math.exp %26 : vector<128x128xf32>
      %cst_9 = arith.constant dense<0.000000e+00> : vector<128xf32>
      %28 = vector.multi_reduction <add>, %27, %cst_9 [1] : vector<128x128xf32> to vector<128xf32>
      %29 = vector.shape_cast %28 : vector<128xf32> to vector<128x1xf32>
      %30 = math.log %29 : vector<128x1xf32>
      %31 = vector.broadcast %30 : vector<128x1xf32> to vector<128x128xf32>
      %32 = arith.subf %26, %31 : vector<128x128xf32>
      %c0_10 = arith.constant 0 : index
      %c0_11 = arith.constant 0 : index
      %33 = vector.load %arg10[%c0_10, %c0_11] : memref<128x128xf32, #tpu.memory_space<vmem>>, vector<128x128xf32>
      tpu.vector_store %arg10[%c0_10, %c0_11], %32 {strides = array<i32>} : memref<128x128xf32, #tpu.memory_space<vmem>>, vector<128x128xf32>,
    } else {
    }
    return
  }
  func.func @transform_0(%arg0: i32, %arg1: i32) -> (i32, i32) {
    %c0_i32 = arith.constant 0 : i32
    %c0_i32_0 = arith.constant 0 : i32
    %c0_i32_1 = arith.constant 0 : i32
    return %c0_i32, %c0_i32_0 : i32, i32
  }
  func.func @transform_1(%arg0: i32, %arg1: i32) -> (i32, i32) {
    %c0_i32 = arith.constant 0 : i32
    %c0_i32_0 = arith.constant 0 : i32
    %c0_i32_1 = arith.constant 0 : i32
    return %c0_i32, %c0_i32_0 : i32, i32
  }
  func.func @transform_2(%arg0: i32, %arg1: i32) -> (i32, i32) {
    %c0_i32 = arith.constant 0 : i32
    %c0_i32_0 = arith.constant 0 : i32
    %c0_i32_1 = arith.constant 0 : i32
    return %c0_i32, %c0_i32_0 : i32, i32
  }
  func.func @transform_3(%arg0: i32, %arg1: i32) -> (i32, i32) {
    %c0_i32 = arith.constant 0 : i32
    %c0_i32_0 = arith.constant 0 : i32
    %c0_i32_1 = arith.constant 0 : i32
    return %c0_i32, %c0_i32_0 : i32, i32
  }
  func.func @transform_4(%arg0: i32, %arg1: i32) -> (i32, i32) {
    %c0_i32 = arith.constant 0 : i32
    %c0_i32_0 = arith.constant 0 : i32
    %c0_i32_1 = arith.constant 0 : i32
    return %c0_i32, %c0_i32_0 : i32, i32
  }
  func.func @transform_5(%arg0: i32, %arg1: i32) -> (i32, i32) {
    %c0_i32 = arith.constant 0 : i32
    %c0_i32_0 = arith.constant 0 : i32
    %c0_i32_1 = arith.constant 0 : i32
    return %c0_i32, %c0_i32_0 : i32, i32
  }
  func.func @transform_6(%arg0: i32, %arg1: i32) -> (i32, i32) {
    %c0_i32 = arith.constant 0 : i32
    %c0_i32_0 = arith.constant 0 : i32
    %c0_i32_1 = arith.constant 0 : i32
    return %c0_i32, %c0_i32_0 : i32, i32
  }
  func.func @transform_7(%arg0: i32, %arg1: i32) -> (i32, i32) {
    %c0_i32 = arith.constant 0 : i32
    %c0_i32_0 = arith.constant 0 : i32
    %c0_i32_1 = arith.constant 0 : i32
    return %c0_i32, %c0_i32_0 : i32, i32
  }
  func.func @transform_8(%arg0: i32, %arg1: i32) -> (i32, i32) {
    %c2_i32 = arith.constant 2 : i32
    %0 = arith.cmpi eq, %arg0, %c2_i32 : i32
    %c0_i32 = arith.constant 0 : i32
    %1 = arith.select %0, %arg1, %c0_i32 : i32
    %c0_i32_0 = arith.constant 0 : i32
    %c0_i32_1 = arith.constant 0 : i32
    return %1, %c0_i32_0 : i32, i32
  }
}

</mosaic_0001>

<bundles_post_ra>
// kernel: pyg_net_forward.1
= control target key start
LH: loop header
LB: loop body
LE: loop exit
PB: predicated region body
PF: predicated region fallthrough
CT: control target
= control target key end

     0   :  { %s3257_s27 = smov 0   ;;  %s3259_s28 = smov 0   ;;  %s4192_s0 = inlined_call_operand.vmem [shape: bf16[256,256], index: 0, kind: input, shape index: {}]   ;;  %s4193_s1 = inlined_call_operand.vmem [shape: bf16[256,128], index: 1, kind: input, shape index: {}]   ;;  %s4194_s2 = inlined_call_operand.vmem [shape: bf16[128,256], index: 2, kind: input, shape index: {}]   ;;  %s4195_s3 = inlined_call_operand.vmem [shape: bf16[256,128], index: 3, kind: input, shape index: {}]   ;;  %s4196_s4 = inlined_call_operand.vmem [shape: bf16[128,128], index: 4, kind: input, shape index: {}]   ;;  %s4197_s5 = inlined_call_operand.vmem [shape: f32[1,256], index: 5, kind: input, shape index: {}]   ;;  %s4198_s6 = inlined_call_operand.vmem [shape: f32[1,128], index: 6, kind: input, shape index: {}]   ;;  %s4199_s7 = inlined_call_operand.vmem [shape: f32[1,128], index: 7, kind: input, shape index: {}]   ;;  %s4200_s8 = inlined_call_operand.vmem [shape: f32[256,128], index: 8, kind: output, shape index: {}]  }
   0x1   :  { %s3261_s29 = smov 0   ;;  %s3263_s30 = smov 0  }
   0x2   :  { %s3265_s9 = smov 0  }
   0x3 LB: > { %s27_s10 = sadd.s32 1, %s3202_s29  ;;  %s30_s11 = sadd.s32 1, %s3206_s30  ;;  %s3210_s9 = sphi %s3265_s9, %s18_s9   ;;  %s3206_s30 = sphi %s3263_s30, %s4284_s30   ;;  %s3202_s29 = sphi %s3261_s29, %s4283_s29   ;;  %s3198_s28 = sphi %s3259_s28, %s4282_s28   ;;  %s3194_s27 = sphi %s3257_s27, %s4281_s27  }
   0x4   : > { %p28_p0 = scmp.ge.s32.totalorder %s27_s10, 2  ;;  %p2222_p1 = scmp.ge.s32.totalorder %s3210_s9, 1 }
   0x5   : > { %p268_p2 = scmp.lt.s32.totalorder %s3210_s9, 7 }
   0x6   : > { %s4286_s10 = smov (%p28_p0, %s27_s10), 0  ;;  %s4288_s11 = smov (!%p28_p0, %s30_s11), %s3206_s30 }
   0x7   : > { %p269_p3 = pnand %p2222_p1, %p268_p2  ;;  %p32_p4 = scmp.ge.s32.totalorder %s4288_s11, 3 }
   0x9   : > { %s4290_s11 = smov (%p32_p4, %s4288_s11), 0  ;;  %272 = sbr.rel (%p269_p3) target bundleno = 1523 (0x5f3), region = 52 }
   0xe   : > { %p299_p5 = scmp.eq.s32.totalorder %s3198_s28, 2  ;;  %s2225_s12 = sshll.u32 %s3194_s27, 7 }
   0xf   : > { %s3290_s13 = sshra.s32 %s2225_s12, 3  ;;  %s3295_s16 = scalar_lea.vmem %s4192_s0, %s2225_s12 }
  0x10   : > { %s4292_s27 = smov (!%p299_p5, %s3194_s27), 0  ;;  %v3298_v0 = vld [vmem:[%s3295_s16 + $0x4] sm:$0xf]  ;;  %v3301_v1 = vld [vmem:[%s3295_s16] sm:$0xf]  ;;  %p2228_p7 = scmp.ne.s32.totalorder %s3198_s28, 0 }
  0x11   : > { %4201 = vst [vmem:[#allocation4_spill] sm:$0xff] %v3298_v0  ;;  %v3304_v2 = vld [vmem:[%s3295_s16 + $0x4] sm:$0xf]  ;;  %v3307_v3 = vld [vmem:[%s3295_s16] sm:$0xf]  ;;  %s2223_s17 = sshll.u32 %s4292_s27, 4 }
  0x12   : > { %4202 = vst [vmem:[#allocation5_spill] sm:$0xff] %v3301_v1  ;;  %v3310_v4 = vld [vmem:[%s3295_s16 + $0x4] sm:$0xf]  ;;  %v3313_v5 = vld [vmem:[%s3295_s16] sm:$0xf]  ;;  %p302_p6 = scmp.lt.s32.totalorder %s2223_s17, 31 }
  0x13   : > { %v3316_v6 = vld [vmem:[%s3295_s16 + $0x8] sm:$0xf0]  ;;  %v3319_v7 = vld [vmem:[%s3295_s16 + $0x4] sm:$0xf0]  ;;  %v3334_v12 = vld [vmem:[%s3295_s16 + $0x14] sm:$0xf] }
  0x14   : > { %4203 = vst [vmem:[#allocation6_spill] sm:$0xff] %v3316_v6  ;;  %v3322_v8 = vld [vmem:[%s3295_s16 + $0x8] sm:$0xf0]  ;;  %v3325_v9 = vld [vmem:[%s3295_s16 + $0x4] sm:$0xf0]  ;;  %s4294_s17 = smov (!%p302_p6, %s2223_s17), 31 }
  0x15   : > { %4204 = vst [vmem:[#allocation7_spill] sm:$0xff] %v3319_v7  ;;  %v3328_v10 = vld [vmem:[%s3295_s16 + $0x8] sm:$0xf0]  ;;  %v3331_v11 = vld [vmem:[%s3295_s16 + $0x4] sm:$0xf0]  ;;  %s2224_s18 = sshll.u32 %s4294_s17, 3 }
  0x16   : > { %4205 = vst [vmem:[#allocation8_spill] sm:$0xff] %v3334_v12  ;;  %v3337_v13 = vld [vmem:[%s3295_s16 + $0x10] sm:$0xf]  ;;  %v3340_v14 = vld [vmem:[%s3295_s16 + $0x14] sm:$0xf]  ;;  %s3357_s21 = scalar_lea.vmem %s4200_s8, %s2224_s18  ;;  %s2485_s26 = sshll.u32 (!%p2228_p7), %s3290_s13, 2 }
  0x17   : > { %4206 = vst [vmem:[#allocation9_spill] sm:$0xff] %v3337_v13  ;;  %v3343_v15 = vld [vmem:[%s3295_s16 + $0x10] sm:$0xf]  ;;  %v3346_v16 = vld [vmem:[%s3295_s16 + $0x14] sm:$0xf]  ;;  %s3855_s27 = scalar_lea.vmem (!%p2228_p7), [#allocation2], %s2485_s26 }
  0x18   : > { %v3349_v17 = vld [vmem:[%s3295_s16 + $0x10] sm:$0xf]  ;;  %v3352_v18 = vld [vmem:[%s3295_s16 + $0x18] sm:$0xf0]  ;;  %v3360_v19 = vld [vmem:[%s3295_s16 + $0x14] sm:$0xf0] }
  0x19   : > { %4207 = vst [vmem:[#allocation10_spill] sm:$0xff] %v3352_v18  ;;  %v3363_v20 = vld [vmem:[%s3295_s16 + $0x18] sm:$0xf0]  ;;  %v3366_v21 = vld [vmem:[%s3295_s16 + $0x14] sm:$0xf0] }
  0x1a   : > { %4208 = vst [vmem:[#allocation11_spill] sm:$0xff] %v3360_v19  ;;  %v3369_v22 = vld [vmem:[%s3295_s16 + $0x18] sm:$0xf0]  ;;  %v3372_v23 = vld [vmem:[%s3295_s16 + $0x14] sm:$0xf0] }
  0x1b   : > { %v3375_v24 = vld [vmem:[%s3295_s16 + $0x24] sm:$0xf]  ;;  %v3378_v25 = vld [vmem:[%s3295_s16 + $0x20] sm:$0xf]  ;;  %v3393_v30 = vld [vmem:[%s3295_s16 + $0x28] sm:$0xf0] }
  0x1c   : > { %4209 = vst [vmem:[#allocation12_spill] sm:$0xff] %v3375_v24  ;;  %v3381_v26 = vld [vmem:[%s3295_s16 + $0x24] sm:$0xf]  ;;  %v3384_v27 = vld [vmem:[%s3295_s16 + $0x20] sm:$0xf] }
  0x1d   : > { %4210 = vst [vmem:[#allocation13_spill] sm:$0xff] %v3378_v25  ;;  %v3387_v28 = vld [vmem:[%s3295_s16 + $0x24] sm:$0xf]  ;;  %v3390_v29 = vld [vmem:[%s3295_s16 + $0x20] sm:$0xf] }
  0x1e   : > { %4211 = vst [vmem:[#allocation14_spill] sm:$0xff] %v3393_v30  ;;  %v3396_v31 = vld [vmem:[%s3295_s16 + $0x24] sm:$0xf0]  ;;  %v3399_v32 = vld [vmem:[%s3295_s16 + $0x28] sm:$0xf0] }
  0x1f   : > { %4212 = vst [vmem:[#allocation15_spill] sm:$0xff] %v3396_v31  ;;  %v3402_v33 = vld [vmem:[%s3295_s16 + $0x24] sm:$0xf0]  ;;  %v3405_v34 = vld [vmem:[%s3295_s16 + $0x28] sm:$0xf0] }
  0x20   : > { %v3408_v35 = vld [vmem:[%s3295_s16 + $0x24] sm:$0xf0]  ;;  %v3411_v36 = vld [vmem:[%s3295_s16 + $0x34] sm:$0xf]  ;;  %v3414_v37 = vld [vmem:[%s3295_s16 + $0x30] sm:$0xf] }
  0x21   : > { %4213 = vst [vmem:[#allocation16_spill] sm:$0xff] %v3411_v36  ;;  %v3417_v38 = vld [vmem:[%s3295_s16 + $0x34] sm:$0xf]  ;;  %v3420_v39 = vld [vmem:[%s3295_s16 + $0x30] sm:$0xf] }
  0x22   : > { %4214 = vst [vmem:[#allocation17_spill] sm:$0xff] %v3414_v37  ;;  %v3423_v40 = vld [vmem:[%s3295_s16 + $0x34] sm:$0xf]  ;;  %v3426_v41 = vld [vmem:[%s3295_s16 + $0x30] sm:$0xf] }
  0x23   : > { %v3429_v42 = vld [vmem:[%s3295_s16 + $0x38] sm:$0xf0]  ;;  %v3432_v43 = vld [vmem:[%s3295_s16 + $0x34] sm:$0xf0]  ;;  %v3447_v48 = vld [vmem:[%s3295_s16 + $0x44] sm:$0xf] }
  0x24   : > { %4215 = vst [vmem:[#allocation18_spill] sm:$0xff] %v3429_v42  ;;  %v3435_v44 = vld [vmem:[%s3295_s16 + $0x38] sm:$0xf0]  ;;  %v3438_v45 = vld [vmem:[%s3295_s16 + $0x34] sm:$0xf0] }
  0x25   : > { %4216 = vst [vmem:[#allocation19_spill] sm:$0xff] %v3432_v43  ;;  %v3441_v46 = vld [vmem:[%s3295_s16 + $0x38] sm:$0xf0]  ;;  %v3444_v47 = vld [vmem:[%s3295_s16 + $0x34] sm:$0xf0] }
  0x26   : > { %4217 = vst [vmem:[#allocation20_spill] sm:$0xff] %v3447_v48  ;;  %v3450_v49 = vld [vmem:[%s3295_s16 + $0x40] sm:$0xf]  ;;  %v3453_v50 = vld [vmem:[%s3295_s16 + $0x44] sm:$0xf] }
  0x27   : > { %4218 = vst [vmem:[#allocation21_spill] sm:$0xff] %v3450_v49  ;;  %v3456_v51 = vld [vmem:[%s3295_s16 + $0x40] sm:$0xf]  ;;  %v3459_v52 = vld [vmem:[%s3295_s16 + $0x44] sm:$0xf] }
  0x28   : > { %4219 = vst [vmem:[#allocation22_spill] sm:$0xff] %v3453_v50  ;;  %v3462_v53 = vld [vmem:[%s3295_s16 + $0x40] sm:$0xf]  ;;  %v3465_v54 = vld [vmem:[%s3295_s16 + $0x48] sm:$0xf0] }
  0x29   : > { %4220 = vst [vmem:[#allocation23_spill] sm:$0xff] %v3456_v51  ;;  %v3468_v55 = vld [vmem:[%s3295_s16 + $0x44] sm:$0xf0]  ;;  %v3471_v56 = vld [vmem:[%s3295_s16 + $0x48] sm:$0xf0] }
  0x2a   : > { %4221 = vst [vmem:[#allocation24_spill] sm:$0xff] %v3465_v54  ;;  %v3474_v57 = vld [vmem:[%s3295_s16 + $0x44] sm:$0xf0]  ;;  %v3477_v58 = vld [vmem:[%s3295_s16 + $0x48] sm:$0xf0] }
  0x2b   : > { %4222 = vst [vmem:[#allocation25_spill] sm:$0xff] %v3468_v55  ;;  %v3480_v59 = vld [vmem:[%s3295_s16 + $0x44] sm:$0xf0]  ;;  %v3483_v60 = vld [vmem:[%s3295_s16 + $0x54] sm:$0xf] }
  0x2c   : > { %4223 = vst [vmem:[#allocation26_spill] sm:$0xff] %v3471_v56  ;;  %v3486_v61 = vld [vmem:[%s3295_s16 + $0x50] sm:$0xf]  ;;  %v3489_v62 = vld [vmem:[%s3295_s16 + $0x54] sm:$0xf] }
  0x2d   : > { %4224 = vst [vmem:[#allocation27_spill] sm:$0xff] %v3474_v57  ;;  %v3492_v63 = vld [vmem:[%s3295_s16 + $0x50] sm:$0xf]  ;;  %v3495_v36 = vld [vmem:[%s3295_s16 + $0x54] sm:$0xf] }
  0x2e   : > { %4225 = vst [vmem:[#allocation28_spill] sm:$0xff] %v3483_v60  ;;  %v3498_v42 = vld [vmem:[%s3295_s16 + $0x50] sm:$0xf]  ;;  %v3501_v43 = vld [vmem:[%s3295_s16 + $0x58] sm:$0xf0] }
  0x2f   : > { %4226 = vst [vmem:[#allocation29_spill] sm:$0xff] %v3486_v61  ;;  %v3504_v37 = vld [vmem:[%s3295_s16 + $0x54] sm:$0xf0]  ;;  %v3507_v24 = vld [vmem:[%s3295_s16 + $0x58] sm:$0xf0] }
  0x30   : > { %4227 = vst [vmem:[#allocation30_spill] sm:$0xff] %v3489_v62  ;;  %v3510_v30 = vld [vmem:[%s3295_s16 + $0x54] sm:$0xf0]  ;;  %v3513_v31 = vld [vmem:[%s3295_s16 + $0x58] sm:$0xf0] }
  0x31   : > { %4228 = vst [vmem:[#allocation31_spill] sm:$0xff] %v3492_v63  ;;  %v3516_v25 = vld [vmem:[%s3295_s16 + $0x54] sm:$0xf0]  ;;  %v3519_v60 = vld [vmem:[%s3295_s16 + $0x64] sm:$0xf] }
  0x32   : > { %4229 = vst [vmem:[#allocation32_spill] sm:$0xff] %v3501_v43  ;;  %v3522_v43 = vld [vmem:[%s3295_s16 + $0x60] sm:$0xf]  ;;  %v3525_v12 = vld [vmem:[%s3295_s16 + $0x64] sm:$0xf] }
  0x33   : > { %4230 = vst [vmem:[#allocation33_spill] sm:$0xff] %v3504_v37  ;;  %v3528_v18 = vld [vmem:[%s3295_s16 + $0x60] sm:$0xf]  ;;  %v3531_v37 = vld [vmem:[%s3295_s16 + $0x64] sm:$0xf] }
  0x34   : > { %4231 = vst [vmem:[#allocation34_spill] sm:$0xff] %v3507_v24  ;;  %v3534_v61 = vld [vmem:[%s3295_s16 + $0x60] sm:$0xf]  ;;  %v3537_v19 = vld [vmem:[%s3295_s16 + $0x68] sm:$0xf0] }
  0x35   : > { %4232 = vst [vmem:[#allocation35_spill] sm:$0xff] %v3510_v30  ;;  %v3546_v13 = vld [vmem:[%s3295_s16 + $0x64] sm:$0xf0]  ;;  %v3549_v48 = vld [vmem:[%s3295_s16 + $0x68] sm:$0xf0] }
  0x36   : > { %4233 = vst [vmem:[#allocation36_spill] sm:$0xff] %v3519_v60  ;;  %v3540_v60 = vld [vmem:[%s3295_s16 + $0x64] sm:$0xf0]  ;;  %v3555_v0 = vld [vmem:[%s3295_s16 + $0x74] sm:$0xf] }
  0x37   : > { %4234 = vst [vmem:[#allocation37_spill] sm:$0xff] %v3522_v43  ;;  %v3543_v43 = vld [vmem:[%s3295_s16 + $0x68] sm:$0xf0]  ;;  %v3552_v54 = vld [vmem:[%s3295_s16 + $0x64] sm:$0xf0] }
  0x38   : > { %4235 = vst [vmem:[#allocation38_spill] sm:$0xff] %v3537_v19  ;;  %v3558_v6 = vld [vmem:[%s3295_s16 + $0x70] sm:$0xf]  ;;  %v3561_v55 = vld [vmem:[%s3295_s16 + $0x74] sm:$0xf] }
  0x39   : > { %4236 = vst [vmem:[#allocation39_spill] sm:$0xff] %v3540_v60  ;;  %v3564_v49 = vld [vmem:[%s3295_s16 + $0x70] sm:$0xf]  ;;  %v3567_v19 = vld [vmem:[%s3295_s16 + $0x74] sm:$0xf]  ;;  %334 = sbr.rel (%p2228_p7) target bundleno = 630 (0x276), region = 56 }
  0x3a   : > { %4237 = vst [vmem:[#allocation40_spill] sm:$0xff] %v3555_v0  ;;  %v3570_v60 = vld [vmem:[%s3295_s16 + $0x70] sm:$0xf]  ;;  %v3573_v7 = vld [vmem:[%s3295_s16 + $0x78] sm:$0xf0] }
  0x3b   : > { %4238 = vst [vmem:[#allocation41_spill] sm:$0xff] %v3558_v6  ;;  %v3576_v1 = vld [vmem:[%s3295_s16 + $0x74] sm:$0xf0]  ;;  %v3579_v62 = vld [vmem:[%s3295_s16 + $0x78] sm:$0xf0] }
  0x3c   : > { %4239 = vst [vmem:[#allocation42_spill] sm:$0xff] %v3573_v7  ;;  %v3582_v24 = vld [vmem:[%s3295_s16 + $0x74] sm:$0xf0]  ;;  %v3585_v30 = vld [vmem:[%s3295_s16 + $0x78] sm:$0xf0] }
  0x3d   : > { %4240 = vst [vmem:[#allocation43_spill] sm:$0xff] %v3576_v1  ;;  %v3588_v0 = vld [vmem:[%s3295_s16 + $0x74] sm:$0xf0] }
  0x3e   : > { %v2835_v6 = vld [vmem:[%s4193_s1 + $0x38] sm:$0xff]  ;;  %v2834_v1 = vld [vmem:[%s4193_s1 + $0x30] sm:$0xff]  ;;  %v2833_v50 = vld [vmem:[%s4193_s1 + $0x28] sm:$0xff]  ;;  %v2236_v51 = vor.u32 %v3310_v4, %v3328_v10  ;;  %v2268_v4 = vor.u32 %v3459_v52, %v3477_v58 }
  0x3f   : > { %v2843_v7 = vld [vmem:[%s4193_s1 + $0x78] sm:$0xff]  ;;  %543 = vmatpush.bf16.msra.mxu0 %v2835_v6  ;;  %v2842_v63 = vld [vmem:[%s4193_s1 + $0x70] sm:$0xff]  ;;  %3010 = vmatpush.bf16.msra.mxu2 %v2835_v6  ;;  %v2841_v56 = vld [vmem:[%s4193_s1 + $0x68] sm:$0xff] }
  0x40   : > { %592 = vmatpush.bf16.msra.mxu1 %v2843_v7  ;;  %3018 = vmatpush.bf16.msra.mxu3 %v2843_v7  ;;  %v2832_v57 = vld [vmem:[%s4193_s1 + $0x20] sm:$0xff]  ;;  %v2831_v7 = vld [vmem:[%s4193_s1 + $0x18] sm:$0xff]  ;;  %v2415_v10 = vld [vmem:[%s4194_s2 + $0x70] sm:$0xf] }
  0x41   : > { %v2840_v6 = vld [vmem:[%s4193_s1 + $0x60] sm:$0xff]  ;;  %v2857_v52 = vld [vmem:[%s4194_s2 + $0x64] sm:$0xf0] }
  0x43   : > { %544 = vmatpush.bf16.msra.mxu0 %v2834_v1  ;;  %3011 = vmatpush.bf16.msra.mxu2 %v2834_v1  ;;  %v2839_v1 = vld [vmem:[%s4193_s1 + $0x58] sm:$0xff] }
  0x44   : > { %593 = vmatpush.bf16.msra.mxu1 %v2842_v63  ;;  %3019 = vmatpush.bf16.msra.mxu3 %v2842_v63  ;;  %v2830_v63 = vld [vmem:[%s4193_s1 + $0x10] sm:$0xff] }
  0x47   : > { %545 = vmatpush.bf16.msra.mxu0 %v2833_v50  ;;  %3012 = vmatpush.bf16.msra.mxu2 %v2833_v50  ;;  %v2838_v50 = vld [vmem:[%s4193_s1 + $0x50] sm:$0xff] }
  0x48   : > { %594 = vmatpush.bf16.msra.mxu1 %v2841_v56  ;;  %3020 = vmatpush.bf16.msra.mxu3 %v2841_v56  ;;  %v2829_v56 = vld [vmem:[%s4193_s1 + $0x8] sm:$0xff] }
  0x4b   : > { %546 = vmatpush.bf16.msra.mxu0 %v2832_v57  ;;  %3013 = vmatpush.bf16.msra.mxu2 %v2832_v57  ;;  %v2837_v57 = vld [vmem:[%s4193_s1 + $0x48] sm:$0xff] }
  0x4c   : > { %595 = vmatpush.bf16.msra.mxu1 %v2840_v6  ;;  %3021 = vmatpush.bf16.msra.mxu3 %v2840_v6  ;;  %v2828_v6 = vld [vmem:[%s4193_s1] sm:$0xff] }
  0x4f   : > { %547 = vmatpush.bf16.msra.mxu0 %v2831_v7  ;;  %3014 = vmatpush.bf16.msra.mxu2 %v2831_v7  ;;  %v2836_v7 = vld [vmem:[%s4193_s1 + $0x40] sm:$0xff] }
  0x50   : > { %596 = vmatpush.bf16.msra.mxu1 %v2839_v1  ;;  %3022 = vmatpush.bf16.msra.mxu3 %v2839_v1  ;;  %v2232_v1 = vor.u32 %v3331_v11, %v3313_v5  ;;  %v2264_v5 = vor.u32 %v3480_v59, %v3462_v53  ;;  %v2859_v11 = vld [vmem:[%s4194_s2 + $0x74] sm:$0xf0]  ;;  %v2856_v53 = vld [vmem:[%s4194_s2 + $0x64] sm:$0xf]  ;;  %v2409_v59 = vld [vmem:[%s4194_s2 + $0x68] sm:$0xf0] }
  0x53   : > { %548 = vmatpush.bf16.msra.mxu0 %v2830_v63  ;;  %3015 = vmatpush.bf16.msra.mxu2 %v2830_v63  ;;  %v2240_v63 = vor.u32 %v3372_v23, %v3349_v17  ;;  %v2416_v17 = vor.u32 %v2859_v11, %v2415_v10  ;;  %v2272_v10 = vor.u32 %v3516_v25, %v3498_v42  ;;  %v2850_v42 = vld [vmem:[%s4194_s2 + $0x34] sm:$0xf] }
  0x54   : > { %597 = vmatpush.bf16.msra.mxu1 %v2838_v50  ;;  %3023 = vmatpush.bf16.msra.mxu3 %v2838_v50  ;;  %v2244_v50 = vor.u32 %v3346_v16, %v3369_v22  ;;  %v2858_v16 = vld [vmem:[%s4194_s2 + $0x74] sm:$0xf]  ;;  %v2417_v22 = vld [vmem:[%s4194_s2 + $0x78] sm:$0xf0]  ;;  %v2276_v11 = vor.u32 %v3495_v36, %v3513_v31  ;;  %v2393_v31 = vld [vmem:[%s4194_s2 + $0x48] sm:$0xf0] }
  0x55   : > { %v2420_v23 = vor.u32 %v2858_v16, %v2417_v22  ;;  %v2391_v16 = vld [vmem:[%s4194_s2 + $0x40] sm:$0xf] }
  0x57   : > { %549 = vmatpush.bf16.msra.mxu0 %v2829_v56  ;;  %3016 = vmatpush.bf16.msra.mxu2 %v2829_v56  ;;  %v2412_v56 = vor.u32 %v2856_v53, %v2409_v59  ;;  %v2848_v53 = vld [vmem:[%s4194_s2 + $0x24] sm:$0xf] }
  0x58   : > { %598 = vmatpush.bf16.msra.mxu1 %v2837_v57  ;;  %3024 = vmatpush.bf16.msra.mxu3 %v2837_v57  ;;  %v2399_v57 = vld [vmem:[%s4194_s2 + $0x50] sm:$0xf] }
  0x5b   : > { %550 = vmatpush.bf16.msra.mxu0 %v2828_v6  ;;  %3017 = vmatpush.bf16.msra.mxu2 %v2828_v6  ;;  %v2855_v6 = vld [vmem:[%s4194_s2 + $0x54] sm:$0xf0] }
  0x5c   : > { %599 = vmatpush.bf16.msra.mxu1 %v2836_v7  ;;  %3025 = vmatpush.bf16.msra.mxu3 %v2836_v7  ;;  %v2854_v7 = vld [vmem:[%s4194_s2 + $0x54] sm:$0xf] }
  0x5e   : > { %551 = vmatmul.bf16.vlgmr.msra.gmra.mxu0 %v2232_v1  ;;  %571 = vmatmul.bf16.vlgmr.msra.gmra.mxu2 %v2264_v5  ;;  %v2401_v1 = vld [vmem:[%s4194_s2 + $0x58] sm:$0xf0]  ;;  %v2248_v5 = vor.u32 %v3408_v35, %v3390_v29  ;;  %v2853_v29 = vld [vmem:[%s4194_s2 + $0x44] sm:$0xf0]  ;;  %v2851_v35 = vld [vmem:[%s4194_s2 + $0x34] sm:$0xf0] }
  0x5f   : > { %600 = vmatmul.bf16.vlgmr.msra.gmra.mxu1 %v2236_v51  ;;  %620 = vmatmul.bf16.vlgmr.msra.gmra.mxu3 %v2268_v4  ;;  %v2407_v51 = vld [vmem:[%s4194_s2 + $0x60] sm:$0xf]  ;;  %v2252_v4 = vor.u32 %v3387_v28, %v3405_v34  ;;  %v2852_v28 = vld [vmem:[%s4194_s2 + $0x44] sm:$0xf]  ;;  %v2392_v25 = vor.u32 %v2853_v29, %v2391_v16  ;;  %v2383_v34 = vld [vmem:[%s4194_s2 + $0x30] sm:$0xf] }
  0x60   : > { %751 = vmatpush.bf16.msrb.mxu2 %v2416_v17  ;;  %v2408_v58 = vor.u32 %v2857_v52, %v2407_v51  ;;  %800 = vmatpush.bf16.msrb.mxu3 %v2420_v23  ;;  %v2396_v36 = vor.u32 %v2852_v28, %v2393_v31  ;;  %v2385_v17 = vld [vmem:[%s4194_s2 + $0x38] sm:$0xf0]  ;;  %v2384_v22 = vor.u32 %v2851_v35, %v2383_v34  ;;  %v2375_v51 = vld [vmem:[%s4194_s2 + $0x20] sm:$0xf]  ;;  %v2849_v52 = vld [vmem:[%s4194_s2 + $0x24] sm:$0xf0] }
  0x61   : > { %v2388_v23 = vor.u32 %v2850_v42, %v2385_v17  ;;  %v2376_v59 = vor.u32 %v2849_v52, %v2375_v51 }
  0x64   : > { %752 = vmatpush.bf16.msrb.mxu2 %v2408_v58  ;;  %801 = vmatpush.bf16.msrb.mxu3 %v2412_v56  ;;  %v2377_v58 = vld [vmem:[%s4194_s2 + $0x28] sm:$0xf0] }
  0x65   : > { %v2380_v56 = vor.u32 %v2848_v53, %v2377_v58 }
  0x6e   : > { %556 = vmatmul.bf16.gmra.mxu0 %v2240_v63  ;;  %v2400_v63 = vor.u32 %v2855_v6, %v2399_v57  ;;  %576 = vmatmul.bf16.gmra.mxu2 %v2272_v10  ;;  %v2367_v57 = vld [vmem:[%s4194_s2 + $0x10] sm:$0xf]  ;;  %v2847_v6 = vld [vmem:[%s4194_s2 + $0x14] sm:$0xf0]  ;;  %v2284_v10 = vor.u32 %v3531_v37, %v3549_v48  ;;  %v2359_v37 = vld [vmem:[%s4194_s2] sm:$0xf] }
  0x6f   : > { %605 = vmatmul.bf16.gmra.mxu1 %v2244_v50  ;;  %v2404_v50 = vor.u32 %v2854_v7, %v2401_v1  ;;  %625 = vmatmul.bf16.gmra.mxu3 %v2276_v11  ;;  %v2256_v7 = vor.u32 %v3444_v47, %v3426_v41  ;;  %v2260_v1 = vor.u32 %v3423_v40, %v3441_v46  ;;  %v2845_v47 = vld [vmem:[%s4194_s2 + $0x4] sm:$0xf0]  ;;  %v2844_v48 = vld [vmem:[%s4194_s2 + $0x4] sm:$0xf] }
  0x70   : > { %753 = vmatpush.bf16.msrb.mxu2 %v2400_v63  ;;  %v2846_v63 = vld [vmem:[%s4194_s2 + $0x14] sm:$0xf]  ;;  %v2288_v40 = vor.u32 %v3588_v0, %v3570_v60  ;;  %v2292_v46 = vor.u32 %v3567_v19, %v3585_v30  ;;  %v2361_v0 = vld [vmem:[%s4194_s2 + $0x8] sm:$0xf0] }
  0x71   : > { %802 = vmatpush.bf16.msrb.mxu3 %v2404_v50  ;;  %v2369_v50 = vld [vmem:[%s4194_s2 + $0x18] sm:$0xf0]  ;;  %v2364_v19 = vor.u32 %v2844_v48, %v2361_v0 }
  0x72   : > { %v2372_v41 = vor.u32 %v2846_v63, %v2369_v50 }
  0x74   : > { %754 = vmatpush.bf16.msrb.mxu2 %v2392_v25 }
  0x75   : > { %803 = vmatpush.bf16.msrb.mxu3 %v2396_v36 }
  0x78   : > { %755 = vmatpush.bf16.msrb.mxu2 %v2384_v22 }
  0x79   : > { %804 = vmatpush.bf16.msrb.mxu3 %v2388_v23 }
  0x7c   : > { %756 = vmatpush.bf16.msrb.mxu2 %v2376_v59 }
  0x7d   : > { %805 = vmatpush.bf16.msrb.mxu3 %v2380_v56 }
  0x7e   : > { %561 = vmatmul.bf16.gmra.mxu0 %v2248_v5  ;;  %v2368_v5 = vor.u32 %v2847_v6, %v2367_v57 }
  0x7f   : > { %610 = vmatmul.bf16.gmra.mxu1 %v2252_v4  ;;  %v2280_v4 = vor.u32 %v3552_v54, %v3534_v61  ;;  %630 = vmatmul.bf16.gmra.mxu3 %v2284_v10  ;;  %v2360_v54 = vor.u32 %v2845_v47, %v2359_v37  ;;  %v2866_v37 = vld [vmem:[%s4195_s3 + $0x30] sm:$0xff] }
  0x80   : > { %757 = vmatpush.bf16.msrb.mxu2 %v2368_v5  ;;  %v2874_v47 = vld [vmem:[%s4195_s3 + $0x70] sm:$0xff] }
  0x81   : > { %581 = vmatmul.bf16.gmra.mxu2 %v2280_v4  ;;  %806 = vmatpush.bf16.msrb.mxu3 %v2372_v41 }
  0x84   : > { %758 = vmatpush.bf16.msrb.mxu2 %v2360_v54 }
  0x85   : > { %807 = vmatpush.bf16.msrb.mxu3 %v2364_v19 }
  0x8e   : > { %566 = vmatmul.bf16.gmra.mxu0 %v2256_v7 }
  0x8f   : > { %615 = vmatmul.bf16.gmra.mxu1 %v2260_v1  ;;  %635 = vmatmul.bf16.gmra.mxu3 %v2292_v46  ;;  %v2875_v46 = vld [vmem:[%s4195_s3 + $0x78] sm:$0xff] }
  0x90   : > { %1074 = vmatpush.bf16.msrb.mxu1 %v2875_v46 }
  0x91   : > { %586 = vmatmul.bf16.gmra.mxu2 %v2288_v40  ;;  %v2867_v40 = vld [vmem:[%s4195_s3 + $0x38] sm:$0xff] }
  0x92   : > { %1025 = vmatpush.bf16.msrb.mxu0 %v2867_v40  ;;  %v665_v40 = vld [vmem:[%s4197_s5] sm:$0x3] }
  0x94   : > { %1075 = vmatpush.bf16.msrb.mxu1 %v2874_v47  ;;  %v3818_v47 = vperm.slane %v665_v40, 0 }
  0x96   : > { %1026 = vmatpush.bf16.msrb.mxu0 %v2866_v37 }
  0xdb   : > { %v552_v30 = vpop.f32.mrf.mxu0 }
  0xdc   : > { %v601_v60 = vpop.f32.mrf.mxu1 }
  0xdd   : > { %v602_v16 = vadd.f32 %v601_v60, %v552_v30 }
  0xe1   : > { %v572_v56 = vpop.f32.mrf.mxu2 }
  0xe2   : > { %v621_v57 = vpop.f32.mrf.mxu3 }
  0xe3   : > { %v554_v61 = vpop.f32.mrf.mxu0  ;;  %v622_v0 = vadd.f32 %v621_v57, %v572_v56 }
  0xe4   : > { %v603_v11 = vpop.f32.mrf.mxu1 }
  0xe5   : > { %v604_v29 = vadd.f32 %v603_v11, %v554_v61  ;;  %v2865_v11 = vld [vmem:[%s4195_s3 + $0x28] sm:$0xff] }
  0xe6   : > { %1027 = vmatpush.bf16.msrb.mxu0 %v2865_v11 }
  0xe7   : > { %v641_v28 = vpack.c.bf16 %v604_v29, %v602_v16  ;;  %v2873_v16 = vld [vmem:[%s4195_s3 + $0x68] sm:$0xff]  ;;  %v2864_v29 = vld [vmem:[%s4195_s3 + $0x20] sm:$0xff] }
  0xe8   : > { %1076 = vmatpush.bf16.msrb.mxu1 %v2873_v16 }
  0xe9   : > { %759 = vmatmul.bf16.vlgmr.msrb.gmra.mxu2 %v641_v28  ;;  %808 = vmatmul.bf16.vlgmr.msrb.gmra.mxu3 %v641_v28  ;;  %v574_v1 = vpop.f32.mrf.mxu2  ;;  %v2872_v28 = vld [vmem:[%s4195_s3 + $0x60] sm:$0xff] }
  0xea   : > { %v623_v63 = vpop.f32.mrf.mxu3  ;;  %1028 = vmatpush.bf16.msrb.mxu0 %v2864_v29 }
  0xeb   : > { %v557_v25 = vpop.f32.mrf.mxu0  ;;  %v624_v19 = vadd.f32 %v623_v63, %v574_v1  ;;  %v2860_v1 = vld [vmem:[%s4195_s3] sm:$0xff] }
  0xec   : > { %v606_v31 = vpop.f32.mrf.mxu1  ;;  %1077 = vmatpush.bf16.msrb.mxu1 %v2872_v28  ;;  %v2868_v63 = vld [vmem:[%s4195_s3 + $0x40] sm:$0xff] }
  0xed   : > { %v607_v36 = vadd.f32 %v606_v31, %v557_v25  ;;  %v645_v30 = vpack.c.bf16 %v624_v19, %v622_v0 }
  0xf1   : > { %v577_v48 = vpop.f32.mrf.mxu2 }
  0xf2   : > { %v626_v54 = vpop.f32.mrf.mxu3 }
  0xf3   : > { %v559_v34 = vpop.f32.mrf.mxu0 }
  0xf4   : > { %v608_v35 = vpop.f32.mrf.mxu1 }
  0xf5   : > { %v609_v42 = vadd.f32 %v608_v35, %v559_v34  ;;  %v627_v34 = vadd.f32 %v626_v54, %v577_v48  ;;  %v3820_v48 = vperm.slane %v665_v40, 1 }
  0xf7   : > { %v642_v17 = vpack.c.bf16 %v609_v42, %v607_v36  ;;  %v2863_v42 = vld [vmem:[%s4195_s3 + $0x18] sm:$0xff] }
  0xf8   : > { %1029 = vmatpush.bf16.msrb.mxu0 %v2863_v42 }
  0xf9   : > { %764 = vmatmul.bf16.gmra.mxu2 %v642_v17  ;;  %813 = vmatmul.bf16.gmra.mxu3 %v642_v17  ;;  %v579_v60 = vpop.f32.mrf.mxu2  ;;  %v2871_v17 = vld [vmem:[%s4195_s3 + $0x58] sm:$0xff] }
  0xfa   : > { %v628_v61 = vpop.f32.mrf.mxu3  ;;  %1078 = vmatpush.bf16.msrb.mxu1 %v2871_v17 }
  0xfb   : > { %v562_v22 = vpop.f32.mrf.mxu0  ;;  %v629_v35 = vadd.f32 %v628_v61, %v579_v60 }
  0xfc   : > { %v611_v23 = vpop.f32.mrf.mxu1 }
  0xfd   : > { %v612_v53 = vadd.f32 %v611_v23, %v562_v22  ;;  %v646_v36 = vpack.c.bf16 %v629_v35, %v627_v34  ;;  %v2862_v22 = vld [vmem:[%s4195_s3 + $0x10] sm:$0xff] }
  0xfe   : > { %v2870_v23 = vld [vmem:[%s4195_s3 + $0x50] sm:$0xff]  ;;  %1030 = vmatpush.bf16.msrb.mxu0 %v2862_v22 }
  0xff   : > { %1079 = vmatpush.bf16.msrb.mxu1 %v2870_v23 }
 0x102   : > { %v631_v31 = vpop.f32.mrf.mxu3 }
 0x103   : > { %v564_v51 = vpop.f32.mrf.mxu0 }
 0x104   : > { %v613_v52 = vpop.f32.mrf.mxu1  ;;  %v582_v25 = vpop.f32.mrf.mxu2 }
 0x105   : > { %v614_v58 = vadd.f32 %v613_v52, %v564_v51 }
 0x107   : > { %v643_v59 = vpack.c.bf16 %v614_v58, %v612_v53  ;;  %v2861_v53 = vld [vmem:[%s4195_s3 + $0x8] sm:$0xff] }
 0x108   : > { %v2869_v58 = vld [vmem:[%s4195_s3 + $0x48] sm:$0xff]  ;;  %1031 = vmatpush.bf16.msrb.mxu0 %v2861_v53 }
 0x109   : > { %769 = vmatmul.bf16.gmra.mxu2 %v643_v59  ;;  %818 = vmatmul.bf16.gmra.mxu3 %v643_v59  ;;  %v632_v59 = vadd.f32 %v631_v31, %v582_v25 }
 0x10a   : > { %v633_v52 = vpop.f32.mrf.mxu3  ;;  %1080 = vmatpush.bf16.msrb.mxu1 %v2869_v58 }
 0x10b   : > { %v567_v6 = vpop.f32.mrf.mxu0 }
 0x10c   : > { %v616_v7 = vpop.f32.mrf.mxu1  ;;  %v584_v51 = vpop.f32.mrf.mxu2  ;;  %1032 = vmatpush.bf16.msrb.mxu0 %v2860_v1 }
 0x10d   : > { %v617_v4 = vadd.f32 %v616_v7, %v567_v6  ;;  %v634_v56 = vadd.f32 %v633_v52, %v584_v51 }
 0x10e   : > { %1081 = vmatpush.bf16.msrb.mxu1 %v2868_v63 }
 0x10f   : > { %v647_v7 = vpack.c.bf16 %v634_v56, %v632_v59 }
 0x112   : > { %v636_v6 = vpop.f32.mrf.mxu3 }
 0x113   : > { %v569_v50 = vpop.f32.mrf.mxu0 }
 0x114   : > { %v618_v5 = vpop.f32.mrf.mxu1  ;;  %v587_v57 = vpop.f32.mrf.mxu2 }
 0x115   : > { %v619_v10 = vadd.f32 %v618_v5, %v569_v50 }
 0x117   : > { %v644_v41 = vpack.c.bf16 %v619_v10, %v617_v4  ;;  %v637_v4 = vadd.f32 %v636_v6, %v587_v57 }
 0x119   : > { %774 = vmatmul.bf16.gmra.mxu2 %v644_v41  ;;  %823 = vmatmul.bf16.gmra.mxu3 %v644_v41 }
 0x11a   : > { %v638_v5 = vpop.f32.mrf.mxu3 }
 0x11c   : > { %v589_v50 = vpop.f32.mrf.mxu2 }
 0x11d   : > { %v639_v10 = vadd.f32 %v638_v5, %v589_v50 }
 0x11f   : > { %v648_v41 = vpack.c.bf16 %v639_v10, %v637_v4 }
 0x129   : > { %779 = vmatmul.bf16.gmra.mxu2 %v645_v30  ;;  %828 = vmatmul.bf16.gmra.mxu3 %v645_v30 }
 0x139   : > { %784 = vmatmul.bf16.gmra.mxu2 %v646_v36  ;;  %833 = vmatmul.bf16.gmra.mxu3 %v646_v36 }
 0x149   : > { %789 = vmatmul.bf16.gmra.mxu2 %v647_v7  ;;  %838 = vmatmul.bf16.gmra.mxu3 %v647_v7 }
 0x159   : > { %794 = vmatmul.bf16.gmra.mxu2 %v648_v41  ;;  %843 = vmatmul.bf16.gmra.mxu3 %v648_v41 }
 0x16c   : > { %v760_v46 = vpop.f32.mrf.mxu2  ;;  %v809_v37 = vpop.f32.mrf.mxu3 }
 0x16d   : > { %v761_v54 = vadd.f32 %v760_v46, %v3818_v47  ;;  %v810_v0 = vadd.f32 %v809_v37, %v3820_v48 }
 0x16f   : > { %v849_v11 = vmax.f32 %v761_v54, 0.0  ;;  %v850_v16 = vmax.f32 %v810_v0, 0.0 }
 0x174   : > { %v762_v19 = vpop.f32.mrf.mxu2  ;;  %v811_v30 = vpop.f32.mrf.mxu3 }
 0x175   : > { %v763_v60 = vadd.f32 %v762_v19, %v3818_v47  ;;  %v812_v61 = vadd.f32 %v811_v30, %v3820_v48 }
 0x177   : > { %v851_v29 = vmax.f32 %v763_v60, 0.0  ;;  %v852_v28 = vmax.f32 %v812_v61, 0.0 }
 0x179   : > { %v881_v25 = vpack.c.bf16 %v851_v29, %v849_v11  ;;  %v882_v31 = vpack.c.bf16 %v852_v28, %v850_v16 }
 0x17b   : > { %1033 = vmatmul.bf16.vlgmr.msrb.gmra.mxu0 %v881_v25  ;;  %1082 = vmatmul.bf16.vlgmr.msrb.gmra.mxu1 %v882_v31 }
 0x17c   : > { %v765_v34 = vpop.f32.mrf.mxu2  ;;  %v814_v35 = vpop.f32.mrf.mxu3 }
 0x17d   : > { %v766_v36 = vadd.f32 %v765_v34, %v3818_v47  ;;  %v815_v42 = vadd.f32 %v814_v35, %v3820_v48 }
 0x17f   : > { %v853_v52 = vmax.f32 %v766_v36, 0.0  ;;  %v854_v53 = vmax.f32 %v815_v42, 0.0 }
 0x184   : > { %v767_v17 = vpop.f32.mrf.mxu2  ;;  %v816_v22 = vpop.f32.mrf.mxu3 }
 0x185   : > { %v768_v23 = vadd.f32 %v767_v17, %v3818_v47  ;;  %v817_v51 = vadd.f32 %v816_v22, %v3820_v48 }
 0x187   : > { %v855_v58 = vmax.f32 %v768_v23, 0.0  ;;  %v856_v59 = vmax.f32 %v817_v51, 0.0 }
 0x189   : > { %v883_v56 = vpack.c.bf16 %v855_v58, %v853_v52  ;;  %v884_v57 = vpack.c.bf16 %v856_v59, %v854_v53 }
 0x18b   : > { %1038 = vmatmul.bf16.gmra.mxu0 %v883_v56  ;;  %1087 = vmatmul.bf16.gmra.mxu1 %v884_v57 }
 0x18c   : > { %v770_v6 = vpop.f32.mrf.mxu2  ;;  %v819_v7 = vpop.f32.mrf.mxu3 }
 0x18d   : > { %v771_v1 = vadd.f32 %v770_v6, %v3818_v47  ;;  %v820_v63 = vadd.f32 %v819_v7, %v3820_v48 }
 0x18f   : > { %v857_v41 = vmax.f32 %v771_v1, 0.0  ;;  %v858_v40 = vmax.f32 %v820_v63, 0.0 }
 0x194   : > { %v772_v50 = vpop.f32.mrf.mxu2  ;;  %v821_v5 = vpop.f32.mrf.mxu3 }
 0x195   : > { %v773_v4 = vadd.f32 %v772_v50, %v3818_v47  ;;  %v822_v10 = vadd.f32 %v821_v5, %v3820_v48 }
 0x197   : > { %v859_v46 = vmax.f32 %v773_v4, 0.0  ;;  %v860_v37 = vmax.f32 %v822_v10, 0.0 }
 0x199   : > { %v885_v54 = vpack.c.bf16 %v859_v46, %v857_v41  ;;  %v886_v0 = vpack.c.bf16 %v860_v37, %v858_v40 }
 0x19b   : > { %1043 = vmatmul.bf16.gmra.mxu0 %v885_v54  ;;  %1092 = vmatmul.bf16.gmra.mxu1 %v886_v0 }
 0x19c   : > { %v775_v19 = vpop.f32.mrf.mxu2  ;;  %v824_v30 = vpop.f32.mrf.mxu3 }
 0x19d   : > { %v776_v60 = vadd.f32 %v775_v19, %v3818_v47  ;;  %v825_v61 = vadd.f32 %v824_v30, %v3820_v48 }
 0x19f   : > { %v861_v25 = vmax.f32 %v776_v60, 0.0  ;;  %v862_v31 = vmax.f32 %v825_v61, 0.0 }
 0x1a4   : > { %v777_v11 = vpop.f32.mrf.mxu2  ;;  %v826_v16 = vpop.f32.mrf.mxu3 }
 0x1a5   : > { %v778_v29 = vadd.f32 %v777_v11, %v3818_v47  ;;  %v827_v28 = vadd.f32 %v826_v16, %v3820_v48 }
 0x1a7   : > { %v863_v34 = vmax.f32 %v778_v29, 0.0  ;;  %v864_v35 = vmax.f32 %v827_v28, 0.0 }
 0x1a9   : > { %v887_v36 = vpack.c.bf16 %v863_v34, %v861_v25  ;;  %v888_v42 = vpack.c.bf16 %v864_v35, %v862_v31 }
 0x1ab   : > { %1048 = vmatmul.bf16.gmra.mxu0 %v887_v36  ;;  %1097 = vmatmul.bf16.gmra.mxu1 %v888_v42 }
 0x1ac   : > { %v780_v17 = vpop.f32.mrf.mxu2  ;;  %v829_v22 = vpop.f32.mrf.mxu3 }
 0x1ad   : > { %v781_v23 = vadd.f32 %v780_v17, %v3818_v47  ;;  %v830_v51 = vadd.f32 %v829_v22, %v3820_v48 }
 0x1af   : > { %v865_v56 = vmax.f32 %v781_v23, 0.0  ;;  %v866_v57 = vmax.f32 %v830_v51, 0.0 }
 0x1b4   : > { %v782_v52 = vpop.f32.mrf.mxu2  ;;  %v831_v53 = vpop.f32.mrf.mxu3 }
 0x1b5   : > { %v783_v58 = vadd.f32 %v782_v52, %v3818_v47  ;;  %v832_v59 = vadd.f32 %v831_v53, %v3820_v48 }
 0x1b7   : > { %v867_v6 = vmax.f32 %v783_v58, 0.0  ;;  %v868_v7 = vmax.f32 %v832_v59, 0.0 }
 0x1b9   : > { %v889_v1 = vpack.c.bf16 %v867_v6, %v865_v56  ;;  %v890_v63 = vpack.c.bf16 %v868_v7, %v866_v57 }
 0x1bb   : > { %1053 = vmatmul.bf16.gmra.mxu0 %v889_v1  ;;  %1102 = vmatmul.bf16.gmra.mxu1 %v890_v63 }
 0x1bc   : > { %v785_v50 = vpop.f32.mrf.mxu2  ;;  %v834_v5 = vpop.f32.mrf.mxu3 }
 0x1bd   : > { %v786_v4 = vadd.f32 %v785_v50, %v3818_v47  ;;  %v835_v10 = vadd.f32 %v834_v5, %v3820_v48 }
 0x1bf   : > { %v869_v54 = vmax.f32 %v786_v4, 0.0  ;;  %v870_v0 = vmax.f32 %v835_v10, 0.0 }
 0x1c4   : > { %v787_v41 = vpop.f32.mrf.mxu2  ;;  %v836_v40 = vpop.f32.mrf.mxu3 }
 0x1c5   : > { %v788_v46 = vadd.f32 %v787_v41, %v3818_v47  ;;  %v837_v37 = vadd.f32 %v836_v40, %v3820_v48 }
 0x1c7   : > { %v871_v19 = vmax.f32 %v788_v46, 0.0  ;;  %v872_v30 = vmax.f32 %v837_v37, 0.0 }
 0x1c9   : > { %v891_v60 = vpack.c.bf16 %v871_v19, %v869_v54  ;;  %v892_v61 = vpack.c.bf16 %v872_v30, %v870_v0 }
 0x1cb   : > { %1058 = vmatmul.bf16.gmra.mxu0 %v891_v60  ;;  %1107 = vmatmul.bf16.gmra.mxu1 %v892_v61 }
 0x1cc   : > { %v790_v11 = vpop.f32.mrf.mxu2  ;;  %v839_v16 = vpop.f32.mrf.mxu3 }
 0x1cd   : > { %v791_v29 = vadd.f32 %v790_v11, %v3818_v47  ;;  %v840_v28 = vadd.f32 %v839_v16, %v3820_v48 }
 0x1cf   : > { %v873_v36 = vmax.f32 %v791_v29, 0.0  ;;  %v874_v42 = vmax.f32 %v840_v28, 0.0 }
 0x1d4   : > { %v792_v25 = vpop.f32.mrf.mxu2  ;;  %v841_v31 = vpop.f32.mrf.mxu3 }
 0x1d5   : > { %v793_v34 = vadd.f32 %v792_v25, %v3818_v47  ;;  %v842_v35 = vadd.f32 %v841_v31, %v3820_v48 }
 0x1d7   : > { %v875_v17 = vmax.f32 %v793_v34, 0.0  ;;  %v876_v22 = vmax.f32 %v842_v35, 0.0 }
 0x1d9   : > { %v893_v23 = vpack.c.bf16 %v875_v17, %v873_v36  ;;  %v894_v51 = vpack.c.bf16 %v876_v22, %v874_v42 }
 0x1db   : > { %1063 = vmatmul.bf16.gmra.mxu0 %v893_v23  ;;  %1112 = vmatmul.bf16.gmra.mxu1 %v894_v51 }
 0x1dc   : > { %v795_v52 = vpop.f32.mrf.mxu2  ;;  %v844_v53 = vpop.f32.mrf.mxu3 }
 0x1dd   : > { %v796_v58 = vadd.f32 %v795_v52, %v3818_v47  ;;  %v845_v59 = vadd.f32 %v844_v53, %v3820_v48 }
 0x1df   : > { %v877_v1 = vmax.f32 %v796_v58, 0.0  ;;  %v878_v63 = vmax.f32 %v845_v59, 0.0 }
 0x1e4   : > { %v797_v56 = vpop.f32.mrf.mxu2  ;;  %v846_v57 = vpop.f32.mrf.mxu3 }
 0x1e5   : > { %v798_v6 = vadd.f32 %v797_v56, %v3818_v47  ;;  %v847_v7 = vadd.f32 %v846_v57, %v3820_v48 }
 0x1e7   : > { %v879_v50 = vmax.f32 %v798_v6, 0.0  ;;  %v880_v5 = vmax.f32 %v847_v7, 0.0 }
 0x1e9   : > { %v895_v4 = vpack.c.bf16 %v879_v50, %v877_v1  ;;  %v896_v10 = vpack.c.bf16 %v880_v5, %v878_v63 }
 0x1eb   : > { %1068 = vmatmul.bf16.gmra.mxu0 %v895_v4  ;;  %1117 = vmatmul.bf16.gmra.mxu1 %v896_v10 }
 0x1f8   : > { %v1034_v41 = vpop.f32.mrf.mxu0  ;;  %v1083_v40 = vpop.f32.mrf.mxu1 }
 0x1f9   : > { %v1084_v54 = vadd.f32 %v1083_v40, %v1034_v41 }
 0x200   : > { %v1036_v46 = vpop.f32.mrf.mxu0  ;;  %v1085_v37 = vpop.f32.mrf.mxu1 }
 0x201   : > { %v1086_v0 = vadd.f32 %v1085_v37, %v1036_v46 }
 0x203   : > { %v2919_v19 = vpack.c.bf16 %v1086_v0, %v1084_v54 }
 0x205   : > { %2920 = vst [vmem:[%s3855_s27] sm:$0xff] %v2919_v19  }
 0x208   : > { %v1039_v47 = vpop.f32.mrf.mxu0  ;;  %v1088_v48 = vpop.f32.mrf.mxu1 }
 0x209   : > { %v1089_v61 = vadd.f32 %v1088_v48, %v1039_v47 }
 0x210   : > { %v1041_v30 = vpop.f32.mrf.mxu0  ;;  %v1090_v60 = vpop.f32.mrf.mxu1 }
 0x211   : > { %v1091_v11 = vadd.f32 %v1090_v60, %v1041_v30 }
 0x213   : > { %v2924_v16 = vpack.c.bf16 %v1091_v11, %v1089_v61 }
 0x215   : > { %2996 = vst [vmem:[%s3855_s27 + $0x8] sm:$0xff] %v2924_v16  }
 0x218   : > { %v1044_v29 = vpop.f32.mrf.mxu0  ;;  %v1093_v28 = vpop.f32.mrf.mxu1 }
 0x219   : > { %v1094_v34 = vadd.f32 %v1093_v28, %v1044_v29 }
 0x220   : > { %v1046_v25 = vpop.f32.mrf.mxu0  ;;  %v1095_v31 = vpop.f32.mrf.mxu1 }
 0x221   : > { %v1096_v35 = vadd.f32 %v1095_v31, %v1046_v25 }
 0x223   : > { %v2929_v36 = vpack.c.bf16 %v1096_v35, %v1094_v34 }
 0x225   : > { %2997 = vst [vmem:[%s3855_s27 + $0x10] sm:$0xff] %v2929_v36  }
 0x228   : > { %v1049_v42 = vpop.f32.mrf.mxu0  ;;  %v1098_v17 = vpop.f32.mrf.mxu1 }
 0x229   : > { %v1099_v51 = vadd.f32 %v1098_v17, %v1049_v42 }
 0x230   : > { %v1051_v22 = vpop.f32.mrf.mxu0  ;;  %v1100_v23 = vpop.f32.mrf.mxu1 }
 0x231   : > { %v1101_v52 = vadd.f32 %v1100_v23, %v1051_v22 }
 0x233   : > { %v2934_v53 = vpack.c.bf16 %v1101_v52, %v1099_v51 }
 0x235   : > { %2998 = vst [vmem:[%s3855_s27 + $0x18] sm:$0xff] %v2934_v53  }
 0x238   : > { %v1054_v58 = vpop.f32.mrf.mxu0  ;;  %v1103_v59 = vpop.f32.mrf.mxu1 }
 0x239   : > { %v1104_v6 = vadd.f32 %v1103_v59, %v1054_v58 }
 0x240   : > { %v1056_v56 = vpop.f32.mrf.mxu0  ;;  %v1105_v57 = vpop.f32.mrf.mxu1 }
 0x241   : > { %v1106_v7 = vadd.f32 %v1105_v57, %v1056_v56 }
 0x243   : > { %v2939_v1 = vpack.c.bf16 %v1106_v7, %v1104_v6 }
 0x245   : > { %2999 = vst [vmem:[%s3855_s27 + $0x20] sm:$0xff] %v2939_v1  }
 0x248   : > { %v1059_v63 = vpop.f32.mrf.mxu0  ;;  %v1108_v50 = vpop.f32.mrf.mxu1 }
 0x249   : > { %v1109_v10 = vadd.f32 %v1108_v50, %v1059_v63 }
 0x250   : > { %v1061_v5 = vpop.f32.mrf.mxu0  ;;  %v1110_v4 = vpop.f32.mrf.mxu1 }
 0x251   : > { %v1111_v41 = vadd.f32 %v1110_v4, %v1061_v5 }
 0x253   : > { %v2944_v40 = vpack.c.bf16 %v1111_v41, %v1109_v10 }
 0x255   : > { %3000 = vst [vmem:[%s3855_s27 + $0x28] sm:$0xff] %v2944_v40  }
 0x258   : > { %v1064_v46 = vpop.f32.mrf.mxu0  ;;  %v1113_v37 = vpop.f32.mrf.mxu1 }
 0x259   : > { %v1114_v19 = vadd.f32 %v1113_v37, %v1064_v46 }
 0x260   : > { %v1066_v54 = vpop.f32.mrf.mxu0  ;;  %v1115_v0 = vpop.f32.mrf.mxu1 }
 0x261   : > { %v1116_v47 = vadd.f32 %v1115_v0, %v1066_v54 }
 0x263   : > { %v2949_v48 = vpack.c.bf16 %v1116_v47, %v1114_v19 }
 0x265   : > { %3001 = vst [vmem:[%s3855_s27 + $0x30] sm:$0xff] %v2949_v48  }
 0x268   : > { %v1069_v30 = vpop.f32.mrf.mxu0  ;;  %v1118_v60 = vpop.f32.mrf.mxu1 }
 0x269   : > { %v1119_v16 = vadd.f32 %v1118_v60, %v1069_v30 }
 0x270   : > { %v1071_v61 = vpop.f32.mrf.mxu0  ;;  %v1120_v11 = vpop.f32.mrf.mxu1 }
 0x271   : > { %v1121_v29 = vadd.f32 %v1120_v11, %v1071_v61 }
 0x273   : > { %v2954_v28 = vpack.c.bf16 %v1121_v29, %v1119_v16 }
 0x275   : > { %3002 = vst [vmem:[%s3855_s27 + $0x38] sm:$0xff] %v2954_v28  }
 0x276 PF: > { %p2486_p8 = scmp.ne.s32.totalorder %s3198_s28, 1 }
 0x277   : > { %s2647_s17 = sshll.u32 (!%p2486_p8), %s3290_s13, 2 }
 0x278   : > { %1160 = sbr.rel (%p2486_p8) target bundleno = 1034 (0x40a), region = 60  ;;  %s1625_s18 = scalar_lea.vmem (!%p2486_p8), [#allocation3], %s2647_s17 }
 0x27d   : > { %v2883_v25 = vld [vmem:[#allocation2 + $0x38] sm:$0xff]  ;;  %v2882_v34 = vld [vmem:[#allocation2 + $0x30] sm:$0xff]  ;;  %v2881_v36 = vld [vmem:[#allocation2 + $0x28] sm:$0xff]  ;;  %v2490_v6 = vor.u32 %v3325_v9, %v3307_v3  ;;  %v2538_v7 = vor.u32 %v3546_v13, %v3528_v18  ;;  %v2494_v1 = vor.u32 %v3304_v2, %v3322_v8  ;;  %v2498_v63 = vor.u32 %v3366_v21, %v3343_v15 }
 0x27e   : > { %v2891_v31 = vld [vmem:[#allocation2 + $0x78] sm:$0xff]  ;;  %1373 = vmatpush.bf16.msra.mxu0 %v2883_v25  ;;  %3026 = vmatpush.bf16.msra.mxu3 %v2883_v25  ;;  %v2890_v35 = vld [vmem:[#allocation2 + $0x70] sm:$0xff]  ;;  %v2889_v42 = vld [vmem:[#allocation2 + $0x68] sm:$0xff]  ;;  %v2546_v3 = vor.u32 %v3582_v24, %v3564_v49  ;;  %v2502_v9 = vor.u32 %v3340_v14, %v3363_v20  ;;  %v2506_v2 = vor.u32 %v3402_v33, %v3384_v27 }
 0x27f   : > { %1422 = vmatpush.bf16.msra.mxu1 %v2891_v31  ;;  %v2880_v17 = vld [vmem:[#allocation2 + $0x20] sm:$0xff]  ;;  %v2879_v23 = vld [vmem:[#allocation2 + $0x18] sm:$0xff]  ;;  %v2878_v52 = vld [vmem:[#allocation2 + $0x10] sm:$0xff]  ;;  %v2542_v8 = vor.u32 %v3525_v12, %v3543_v43  ;;  %v2510_v13 = vor.u32 %v3381_v26, %v3399_v32  ;;  %v2514_v14 = vor.u32 %v3438_v45, %v3420_v39  ;;  %v2550_v15 = vor.u32 %v3561_v55, %v3579_v62 }
 0x280   : > { %v2888_v22 = vld [vmem:[#allocation2 + $0x60] sm:$0xff]  ;;  %v2887_v51 = vld [vmem:[#allocation2 + $0x58] sm:$0xff]  ;;  %v2886_v53 = vld [vmem:[#allocation2 + $0x50] sm:$0xff]  ;;  %v2518_v18 = vor.u32 %v3417_v38, %v3435_v44 }
 0x281   : > { %v2877_v58 = vld [vmem:[#allocation2 + $0x8] sm:$0xff]  ;;  %v2876_v56 = vld [vmem:[#allocation2] sm:$0xff]  ;;  %v2899_v12 = vld [vmem:[%s4196_s4 + $0x38] sm:$0xff] }
 0x282   : > { %1374 = vmatpush.bf16.msra.mxu0 %v2882_v34  ;;  %3027 = vmatpush.bf16.msra.mxu3 %v2882_v34  ;;  %v2885_v59 = vld [vmem:[#allocation2 + $0x48] sm:$0xff]  ;;  %v2884_v57 = vld [vmem:[#allocation2 + $0x40] sm:$0xff]  ;;  %v2898_v20 = vld [vmem:[%s4196_s4 + $0x30] sm:$0xff] }
 0x283   : > { %1423 = vmatpush.bf16.msra.mxu1 %v2890_v35  ;;  %1559 = vmatpush.bf16.msra.mxu2 %v2899_v12  ;;  %v2897_v21 = vld [vmem:[%s4196_s4 + $0x28] sm:$0xff]  ;;  %v2896_v24 = vld [vmem:[%s4196_s4 + $0x20] sm:$0xff]  ;;  %v4241_v26 = vld [vmem:[#allocation23_spill] sm:$0xff] }
 0x284   : > { %v4242_v27 = vld [vmem:[#allocation27_spill] sm:$0xff]  ;;  %v4243_v33 = vld [vmem:[#allocation26_spill] sm:$0xff]  ;;  %v2893_v4 = vld [vmem:[%s4196_s4 + $0x8] sm:$0xff] }
 0x285   : > { %v2522_v32 = vor.u32 %v4242_v27, %v4241_v26  ;;  %v4244_v38 = vld [vmem:[#allocation22_spill] sm:$0xff]  ;;  %v4245_v43 = vld [vmem:[#allocation31_spill] sm:$0xff]  ;;  %v2892_v10 = vld [vmem:[%s4196_s4] sm:$0xff] }
 0x286   : > { %1375 = vmatpush.bf16.msra.mxu0 %v2881_v36  ;;  %3028 = vmatpush.bf16.msra.mxu3 %v2881_v36  ;;  %v2526_v39 = vor.u32 %v4244_v38, %v4243_v33  ;;  %v4246_v44 = vld [vmem:[#allocation35_spill] sm:$0xff]  ;;  %v4247_v49 = vld [vmem:[#allocation34_spill] sm:$0xff]  ;;  %v3925_v40 = vld [vmem:[%s4198_s6] ss:$0 sm:$0xff] }
 0x287   : > { %1424 = vmatpush.bf16.msra.mxu1 %v2889_v42  ;;  %1560 = vmatpush.bf16.msra.mxu2 %v2898_v20  ;;  %v2530_v45 = vor.u32 %v4246_v44, %v4245_v43  ;;  %v4248_v55 = vld [vmem:[#allocation30_spill] sm:$0xff]  ;;  %v2895_v50 = vld [vmem:[%s4196_s4 + $0x18] sm:$0xff] }
 0x288   : > { %v2534_v62 = vor.u32 %v4248_v55, %v4247_v49  ;;  %v2894_v5 = vld [vmem:[%s4196_s4 + $0x10] sm:$0xff] }
 0x28a   : > { %1376 = vmatpush.bf16.msra.mxu0 %v2880_v17  ;;  %3029 = vmatpush.bf16.msra.mxu3 %v2880_v17 }
 0x28b   : > { %1425 = vmatpush.bf16.msra.mxu1 %v2888_v22  ;;  %1561 = vmatpush.bf16.msra.mxu2 %v2897_v21 }
 0x28e   : > { %1377 = vmatpush.bf16.msra.mxu0 %v2879_v23  ;;  %3030 = vmatpush.bf16.msra.mxu3 %v2879_v23 }
 0x28f   : > { %1426 = vmatpush.bf16.msra.mxu1 %v2887_v51  ;;  %1562 = vmatpush.bf16.msra.mxu2 %v2896_v24 }
 0x292   : > { %1378 = vmatpush.bf16.msra.mxu0 %v2878_v52  ;;  %3031 = vmatpush.bf16.msra.mxu3 %v2878_v52 }
 0x293   : > { %1427 = vmatpush.bf16.msra.mxu1 %v2886_v53  ;;  %1563 = vmatpush.bf16.msra.mxu2 %v2895_v50 }
 0x296   : > { %1379 = vmatpush.bf16.msra.mxu0 %v2877_v58  ;;  %3032 = vmatpush.bf16.msra.mxu3 %v2877_v58 }
 0x297   : > { %1428 = vmatpush.bf16.msra.mxu1 %v2885_v59  ;;  %1564 = vmatpush.bf16.msra.mxu2 %v2894_v5 }
 0x29a   : > { %1380 = vmatpush.bf16.msra.mxu0 %v2876_v56  ;;  %3033 = vmatpush.bf16.msra.mxu3 %v2876_v56 }
 0x29b   : > { %1429 = vmatpush.bf16.msra.mxu1 %v2884_v57  ;;  %1565 = vmatpush.bf16.msra.mxu2 %v2893_v4 }
 0x29d   : > { %1381 = vmatmul.bf16.vlgmr.msra.gmra.mxu0 %v2490_v6  ;;  %1411 = vmatmul.bf16.vlgmr.msra.gmra.mxu3 %v2538_v7 }
 0x29e   : > { %3034 = vmatpush.bf16.msrb.mxu3 %v2891_v31  ;;  %1430 = vmatmul.bf16.vlgmr.msra.gmra.mxu1 %v2494_v1 }
 0x29f   : > { %1566 = vmatpush.bf16.msra.mxu2 %v2892_v10 }
 0x2a2   : > { %3035 = vmatpush.bf16.msrb.mxu3 %v2890_v35 }
 0x2a6   : > { %3036 = vmatpush.bf16.msrb.mxu3 %v2889_v42 }
 0x2aa   : > { %3037 = vmatpush.bf16.msrb.mxu3 %v2888_v22 }
 0x2ad   : > { %1386 = vmatmul.bf16.gmra.mxu0 %v2498_v63  ;;  %1416 = vmatmul.bf16.gmra.mxu3 %v2546_v3 }
 0x2ae   : > { %3038 = vmatpush.bf16.msrb.mxu3 %v2887_v51  ;;  %1435 = vmatmul.bf16.gmra.mxu1 %v2502_v9 }
 0x2b2   : > { %3039 = vmatpush.bf16.msrb.mxu3 %v2886_v53 }
 0x2b6   : > { %3040 = vmatpush.bf16.msrb.mxu3 %v2885_v59 }
 0x2ba   : > { %3041 = vmatpush.bf16.msrb.mxu3 %v2884_v57 }
 0x2bd   : > { %1391 = vmatmul.bf16.gmra.mxu0 %v2506_v2  ;;  %1460 = vmatmul.bf16.vlgmr.msrb.gmra.mxu3 %v2542_v8 }
 0x2be   : > { %1440 = vmatmul.bf16.gmra.mxu1 %v2510_v13  ;;  %3042 = vmatpush.bf16.msra.mxu3 %v2899_v12 }
 0x2c2   : > { %3043 = vmatpush.bf16.msra.mxu3 %v2898_v20 }
 0x2c6   : > { %3044 = vmatpush.bf16.msra.mxu3 %v2897_v21 }
 0x2ca   : > { %3045 = vmatpush.bf16.msra.mxu3 %v2896_v24 }
 0x2cd   : > { %1396 = vmatmul.bf16.gmra.mxu0 %v2514_v14  ;;  %1465 = vmatmul.bf16.gmra.mxu3 %v2550_v15 }
 0x2ce   : > { %1445 = vmatmul.bf16.gmra.mxu1 %v2518_v18  ;;  %3046 = vmatpush.bf16.msra.mxu3 %v2895_v50 }
 0x2d2   : > { %3047 = vmatpush.bf16.msra.mxu3 %v2894_v5 }
 0x2d6   : > { %3048 = vmatpush.bf16.msra.mxu3 %v2893_v4 }
 0x2da   : > { %3049 = vmatpush.bf16.msra.mxu3 %v2892_v10 }
 0x2dd   : > { %1401 = vmatmul.bf16.gmra.mxu0 %v2522_v32 }
 0x2de   : > { %1450 = vmatmul.bf16.gmra.mxu1 %v2526_v39 }
 0x2ed   : > { %1406 = vmatmul.bf16.gmra.mxu0 %v2530_v45 }
 0x2ee   : > { %1455 = vmatmul.bf16.gmra.mxu1 %v2534_v62 }
 0x31a   : > { %v1382_v41 = vpop.f32.mrf.mxu0 }
 0x31b   : > { %v1431_v46 = vpop.f32.mrf.mxu1  ;;  %v1383_v37 = vadd.f32 %v3925_v40, %v1382_v41 }
 0x31d   : > { %v1432_v19 = vadd.f32 %v1431_v46, %v1383_v37 }
 0x31f   : > { %v1471_v60 = vmax.f32 %v1432_v19, 0.0 }
 0x320   : > { %v1412_v54 = vpop.f32.mrf.mxu3 }
 0x321   : > { %v1413_v63 = vadd.f32 %v3925_v40, %v1412_v54 }
 0x322   : > { %v1384_v0 = vpop.f32.mrf.mxu0 }
 0x323   : > { %v1385_v47 = vadd.f32 %v3925_v40, %v1384_v0  ;;  %v1433_v48 = vpop.f32.mrf.mxu1 }
 0x325   : > { %v1434_v30 = vadd.f32 %v1433_v48, %v1385_v47 }
 0x327   : > { %v1472_v61 = vmax.f32 %v1434_v30, 0.0 }
 0x328   : > { %v1414_v11 = vpop.f32.mrf.mxu3 }
 0x329   : > { %v1487_v16 = vpack.c.bf16 %v1472_v61, %v1471_v60  ;;  %v1415_v9 = vadd.f32 %v3925_v40, %v1414_v11 }
 0x32a   : > { %v1387_v29 = vpop.f32.mrf.mxu0 }
 0x32b   : > { %v1436_v28 = vpop.f32.mrf.mxu1  ;;  %1567 = vmatmul.bf16.vlgmr.msra.gmra.mxu2 %v1487_v16  ;;  %v1388_v25 = vadd.f32 %v3925_v40, %v1387_v29 }
 0x32d   : > { %v1437_v35 = vadd.f32 %v1436_v28, %v1388_v25 }
 0x32f   : > { %v1473_v22 = vmax.f32 %v1437_v35, 0.0 }
 0x330   : > { %v1417_v31 = vpop.f32.mrf.mxu3 }
 0x331   : > { %v1418_v44 = vadd.f32 %v3925_v40, %v1417_v31 }
 0x332   : > { %v1389_v34 = vpop.f32.mrf.mxu0 }
 0x333   : > { %v1390_v36 = vadd.f32 %v3925_v40, %v1389_v34  ;;  %v1438_v42 = vpop.f32.mrf.mxu1 }
 0x335   : > { %v1439_v17 = vadd.f32 %v1438_v42, %v1390_v36 }
 0x337   : > { %v1474_v23 = vmax.f32 %v1439_v17, 0.0 }
 0x338   : > { %v1419_v51 = vpop.f32.mrf.mxu3 }
 0x339   : > { %v1488_v52 = vpack.c.bf16 %v1474_v23, %v1473_v22  ;;  %v1420_v49 = vadd.f32 %v3925_v40, %v1419_v51 }
 0x33a   : > { %v1392_v53 = vpop.f32.mrf.mxu0 }
 0x33b   : > { %v1441_v58 = vpop.f32.mrf.mxu1  ;;  %1572 = vmatmul.bf16.gmra.mxu2 %v1488_v52  ;;  %v1393_v59 = vadd.f32 %v3925_v40, %v1392_v53 }
 0x33d   : > { %v1442_v6 = vadd.f32 %v1441_v58, %v1393_v59 }
 0x33f   : > { %v1475_v2 = vmax.f32 %v1442_v6, 0.0 }
 0x340   : > { %v1461_v56 = vpop.f32.mrf.mxu3 }
 0x341   : > { %v1462_v8 = vadd.f32 %v1461_v56, %v1413_v63 }
 0x342   : > { %v1394_v57 = vpop.f32.mrf.mxu0 }
 0x343   : > { %v1395_v7 = vadd.f32 %v3925_v40, %v1394_v57  ;;  %v1443_v1 = vpop.f32.mrf.mxu1  ;;  %v1483_v20 = vmax.f32 %v1462_v8, 0.0 }
 0x345   : > { %v1444_v3 = vadd.f32 %v1443_v1, %v1395_v7 }
 0x347   : > { %v1476_v13 = vmax.f32 %v1444_v3, 0.0 }
 0x348   : > { %v1463_v14 = vpop.f32.mrf.mxu3 }
 0x349   : > { %v1464_v15 = vadd.f32 %v1463_v14, %v1415_v9  ;;  %v1489_v18 = vpack.c.bf16 %v1476_v13, %v1475_v2 }
 0x34a   : > { %v1397_v12 = vpop.f32.mrf.mxu0 }
 0x34b   : > { %v1484_v21 = vmax.f32 %v1464_v15, 0.0  ;;  %v1446_v24 = vpop.f32.mrf.mxu1  ;;  %1577 = vmatmul.bf16.gmra.mxu2 %v1489_v18  ;;  %v1398_v27 = vadd.f32 %v3925_v40, %v1397_v12 }
 0x34d   : > { %v1493_v26 = vpack.c.bf16 %v1484_v21, %v1483_v20  ;;  %v1447_v38 = vadd.f32 %v1446_v24, %v1398_v27 }
 0x34f   : > { %1597 = vmatmul.bf16.vlgmr.msra.gmra.mxu3 %v1493_v26  ;;  %v1477_v55 = vmax.f32 %v1447_v38, 0.0 }
 0x350   : > { %v1466_v32 = vpop.f32.mrf.mxu3 }
 0x351   : > { %v1467_v62 = vadd.f32 %v1466_v32, %v1418_v44 }
 0x352   : > { %v1399_v33 = vpop.f32.mrf.mxu0 }
 0x353   : > { %v1400_v39 = vadd.f32 %v3925_v40, %v1399_v33  ;;  %v1448_v43 = vpop.f32.mrf.mxu1  ;;  %v1485_v46 = vmax.f32 %v1467_v62, 0.0 }
 0x355   : > { %v1449_v45 = vadd.f32 %v1448_v43, %v1400_v39 }
 0x357   : > { %v1478_v50 = vmax.f32 %v1449_v45, 0.0 }
 0x358   : > { %v1468_v5 = vpop.f32.mrf.mxu3 }
 0x359   : > { %v1469_v4 = vadd.f32 %v1468_v5, %v1420_v49  ;;  %v1490_v10 = vpack.c.bf16 %v1478_v50, %v1477_v55 }
 0x35a   : > { %v1402_v41 = vpop.f32.mrf.mxu0 }
 0x35b   : > { %v1486_v37 = vmax.f32 %v1469_v4, 0.0  ;;  %v1451_v54 = vpop.f32.mrf.mxu1  ;;  %1582 = vmatmul.bf16.gmra.mxu2 %v1490_v10  ;;  %v1403_v19 = vadd.f32 %v3925_v40, %v1402_v41 }
 0x35d   : > { %v1494_v0 = vpack.c.bf16 %v1486_v37, %v1485_v46  ;;  %v1452_v48 = vadd.f32 %v1451_v54, %v1403_v19 }
 0x35f   : > { %1602 = vmatmul.bf16.gmra.mxu3 %v1494_v0  ;;  %v1479_v11 = vmax.f32 %v1452_v48, 0.0 }
 0x362   : > { %v1404_v47 = vpop.f32.mrf.mxu0 }
 0x363   : > { %v1405_v30 = vadd.f32 %v3925_v40, %v1404_v47  ;;  %v1453_v60 = vpop.f32.mrf.mxu1 }
 0x365   : > { %v1454_v61 = vadd.f32 %v1453_v60, %v1405_v30 }
 0x367   : > { %v1480_v16 = vmax.f32 %v1454_v61, 0.0 }
 0x369   : > { %v1491_v29 = vpack.c.bf16 %v1480_v16, %v1479_v11 }
 0x36a   : > { %v1407_v28 = vpop.f32.mrf.mxu0 }
 0x36b   : > { %v1456_v25 = vpop.f32.mrf.mxu1  ;;  %1587 = vmatmul.bf16.gmra.mxu2 %v1491_v29  ;;  %v1408_v31 = vadd.f32 %v3925_v40, %v1407_v28 }
 0x36d   : > { %v1457_v35 = vadd.f32 %v1456_v25, %v1408_v31 }
 0x36f   : > { %v1481_v22 = vmax.f32 %v1457_v35, 0.0 }
 0x372   : > { %v1409_v34 = vpop.f32.mrf.mxu0 }
 0x373   : > { %v1410_v36 = vadd.f32 %v3925_v40, %v1409_v34  ;;  %v1458_v42 = vpop.f32.mrf.mxu1 }
 0x375   : > { %v1459_v17 = vadd.f32 %v1458_v42, %v1410_v36 }
 0x377   : > { %v1482_v23 = vmax.f32 %v1459_v17, 0.0 }
 0x379   : > { %v1492_v51 = vpack.c.bf16 %v1482_v23, %v1481_v22 }
 0x37b   : > { %1592 = vmatmul.bf16.gmra.mxu2 %v1492_v51 }
 0x3ae   : > { %v1568_v52 = vpop.f32.mrf.mxu2 }
 0x3b6   : > { %v1570_v53 = vpop.f32.mrf.mxu2 }
 0x3b7   : > { %v2959_v58 = vpack.c.bf16 %v1570_v53, %v1568_v52 }
 0x3b9   : > { %2960 = vst [vmem:[%s1625_s18] sm:$0xff] %v2959_v58  }
 0x3be   : > { %v1573_v59 = vpop.f32.mrf.mxu2 }
 0x3c6   : > { %v1575_v56 = vpop.f32.mrf.mxu2 }
 0x3c7   : > { %v2964_v57 = vpack.c.bf16 %v1575_v56, %v1573_v59 }
 0x3c9   : > { %3003 = vst [vmem:[%s1625_s18 + $0x8] sm:$0xff] %v2964_v57  }
 0x3ce   : > { %v1578_v6 = vpop.f32.mrf.mxu2 }
 0x3d2   : > { %v1598_v7 = vpop.f32.mrf.mxu3 }
 0x3d6   : > { %v1580_v1 = vpop.f32.mrf.mxu2 }
 0x3d7   : > { %v2969_v40 = vpack.c.bf16 %v1580_v1, %v1578_v6 }
 0x3d9   : > { %3004 = vst [vmem:[%s1625_s18 + $0x10] sm:$0xff] %v2969_v40  }
 0x3da   : > { %v1600_v63 = vpop.f32.mrf.mxu3 }
 0x3db   : > { %v2989_v3 = vpack.c.bf16 %v1600_v63, %v1598_v7 }
 0x3dd   : > { %3008 = vst [vmem:[%s1625_s18 + $0x30] sm:$0xff] %v2989_v3  }
 0x3de   : > { %v1583_v9 = vpop.f32.mrf.mxu2 }
 0x3e2   : > { %v1603_v2 = vpop.f32.mrf.mxu3 }
 0x3e6   : > { %v1585_v8 = vpop.f32.mrf.mxu2 }
 0x3e7   : > { %v2974_v13 = vpack.c.bf16 %v1585_v8, %v1583_v9 }
 0x3e9   : > { %3005 = vst [vmem:[%s1625_s18 + $0x18] sm:$0xff] %v2974_v13  }
 0x3ea   : > { %v1605_v14 = vpop.f32.mrf.mxu3 }
 0x3eb   : > { %v2994_v15 = vpack.c.bf16 %v1605_v14, %v1603_v2 }
 0x3ed   : > { %3009 = vst [vmem:[%s1625_s18 + $0x38] sm:$0xff] %v2994_v15  }
 0x3ee   : > { %v1588_v18 = vpop.f32.mrf.mxu2 }
 0x3f6   : > { %v1590_v12 = vpop.f32.mrf.mxu2 }
 0x3f7   : > { %v2979_v20 = vpack.c.bf16 %v1590_v12, %v1588_v18 }
 0x3f9   : > { %3006 = vst [vmem:[%s1625_s18 + $0x20] sm:$0xff] %v2979_v20  }
 0x3fe   : > { %v1593_v21 = vpop.f32.mrf.mxu2 }
 0x406   : > { %v1595_v24 = vpop.f32.mrf.mxu2 }
 0x407   : > { %v2984_v26 = vpack.c.bf16 %v1595_v24, %v1593_v21 }
 0x409   : > { %3007 = vst [vmem:[%s1625_s18 + $0x28] sm:$0xff] %v2984_v26  }
 0x40a PF: > { %p2648_p9 = scmp.ne.s32.totalorder %s3198_s28, 2 }
 0x40c   : > { %1645 = sbr.rel (%p2648_p9) target bundleno = 1523 (0x5f3), region = 64 }
 0x411   : > { %v2907_v27 = vld [vmem:[#allocation3 + $0x38] sm:$0xff]  ;;  %v2906_v33 = vld [vmem:[#allocation3 + $0x30] sm:$0xff]  ;;  %v2905_v39 = vld [vmem:[#allocation3 + $0x28] sm:$0xff] }
 0x412   : > { %v2915_v32 = vld [vmem:[#allocation3 + $0x78] sm:$0xff]  ;;  %1858 = vmatpush.bf16.msra.mxu0 %v2907_v27  ;;  %3050 = vmatpush.bf16.msra.mxu2 %v2907_v27  ;;  %v2914_v38 = vld [vmem:[#allocation3 + $0x70] sm:$0xff]  ;;  %v2913_v43 = vld [vmem:[#allocation3 + $0x68] sm:$0xff]  ;;  %v1956_v27 = vlaneseq }
 0x413   : > { %1907 = vmatpush.bf16.msra.mxu1 %v2915_v32  ;;  %3058 = vmatpush.bf16.msra.mxu3 %v2915_v32  ;;  %v2904_v44 = vld [vmem:[#allocation3 + $0x20] sm:$0xff]  ;;  %v2903_v49 = vld [vmem:[#allocation3 + $0x18] sm:$0xff]  ;;  %v2902_v62 = vld [vmem:[#allocation3 + $0x10] sm:$0xff] }
 0x414   : > { %v2912_v45 = vld [vmem:[#allocation3 + $0x60] sm:$0xff]  ;;  %v2911_v55 = vld [vmem:[#allocation3 + $0x58] sm:$0xff]  ;;  %v2910_v50 = vld [vmem:[#allocation3 + $0x50] sm:$0xff] }
 0x415   : > { %v2901_v5 = vld [vmem:[#allocation3 + $0x8] sm:$0xff]  ;;  %v2900_v10 = vld [vmem:[#allocation3] sm:$0xff]  ;;  %v4250_v37 = vld [vmem:[#allocation7_spill] sm:$0xff] }
 0x416   : > { %1859 = vmatpush.bf16.msra.mxu0 %v2906_v33  ;;  %3051 = vmatpush.bf16.msra.mxu2 %v2906_v33  ;;  %v2909_v4 = vld [vmem:[#allocation3 + $0x48] sm:$0xff]  ;;  %v2908_v41 = vld [vmem:[#allocation3 + $0x40] sm:$0xff]  ;;  %v4253_v48 = vld [vmem:[#allocation6_spill] sm:$0xff]  ;;  %v3982_v33 = vand.u32 127, %v1956_v27 }
 0x417   : > { %1908 = vmatpush.bf16.msra.mxu1 %v2914_v38  ;;  %3059 = vmatpush.bf16.msra.mxu3 %v2914_v38  ;;  %v4249_v46 = vld [vmem:[#allocation5_spill] sm:$0xff]  ;;  %v4254_v30 = vld [vmem:[#allocation4_spill] sm:$0xff]  ;;  %v4258_v28 = vld [vmem:[#allocation11_spill] sm:$0xff] }
 0x418   : > { %v2652_v54 = vor.u32 %v4250_v37, %v4249_v46  ;;  %v4251_v0 = vld [vmem:[#allocation21_spill] sm:$0xff]  ;;  %v2656_v60 = vor.u32 %v4254_v30, %v4253_v48  ;;  %v4255_v61 = vld [vmem:[#allocation24_spill] sm:$0xff]  ;;  %v4261_v36 = vld [vmem:[#allocation10_spill] sm:$0xff]  ;;  %vm1958_vm0 = vcmp.lt.s32.totalorder %v3982_v33, 7 }
 0x419   : > { %v4252_v19 = vld [vmem:[#allocation25_spill] sm:$0xff]  ;;  %v4256_v11 = vld [vmem:[#allocation20_spill] sm:$0xff]  ;;  %v4266_v53 = vld [vmem:[#allocation15_spill] sm:$0xff] }
 0x41a   : > { %1860 = vmatpush.bf16.msra.mxu0 %v2905_v39  ;;  %3052 = vmatpush.bf16.msra.mxu2 %v2905_v39  ;;  %v2684_v47 = vor.u32 %v4252_v19, %v4251_v0  ;;  %v2688_v16 = vor.u32 %v4256_v11, %v4255_v61  ;;  %v4257_v29 = vld [vmem:[#allocation9_spill] sm:$0xff]  ;;  %v4262_v42 = vld [vmem:[#allocation8_spill] sm:$0xff]  ;;  %v4268_v56 = vld [vmem:[#allocation39_spill] sm:$0xff] }
 0x41b   : > { %1909 = vmatpush.bf16.msra.mxu1 %v2913_v43  ;;  %3060 = vmatpush.bf16.msra.mxu3 %v2913_v43  ;;  %v2660_v25 = vor.u32 %v4258_v28, %v4257_v29  ;;  %v4259_v31 = vld [vmem:[#allocation29_spill] sm:$0xff]  ;;  %v2664_v17 = vor.u32 %v4262_v42, %v4261_v36  ;;  %v4263_v22 = vld [vmem:[#allocation32_spill] sm:$0xff]  ;;  %v4269_v6 = vld [vmem:[#allocation14_spill] sm:$0xff] }
 0x41c   : > { %v4260_v34 = vld [vmem:[#allocation33_spill] sm:$0xff]  ;;  %v4264_v23 = vld [vmem:[#allocation28_spill] sm:$0xff]  ;;  %v4271_v40 = vld [vmem:[#allocation38_spill] sm:$0xff] }
 0x41d   : > { %v2692_v35 = vor.u32 %v4260_v34, %v4259_v31  ;;  %v2696_v51 = vor.u32 %v4264_v23, %v4263_v22  ;;  %v4265_v52 = vld [vmem:[#allocation13_spill] sm:$0xff]  ;;  %v4270_v7 = vld [vmem:[#allocation12_spill] sm:$0xff]  ;;  %v4274_v2 = vld [vmem:[#allocation19_spill] sm:$0xff] }
 0x41e   : > { %1861 = vmatpush.bf16.msra.mxu0 %v2904_v44  ;;  %3053 = vmatpush.bf16.msra.mxu2 %v2904_v44  ;;  %v2668_v58 = vor.u32 %v4266_v53, %v4265_v52  ;;  %v4267_v59 = vld [vmem:[#allocation37_spill] sm:$0xff]  ;;  %v2672_v1 = vor.u32 %v4270_v7, %v4269_v6  ;;  %v4272_v63 = vld [vmem:[#allocation36_spill] sm:$0xff]  ;;  %v4276_v14 = vld [vmem:[#allocation43_spill] sm:$0xff] }
 0x41f   : > { %1910 = vmatpush.bf16.msra.mxu1 %v2912_v45  ;;  %3061 = vmatpush.bf16.msra.mxu3 %v2912_v45  ;;  %v2700_v57 = vor.u32 %v4268_v56, %v4267_v59  ;;  %v2704_v3 = vor.u32 %v4272_v63, %v4271_v40  ;;  %v4273_v9 = vld [vmem:[#allocation17_spill] sm:$0xff]  ;;  %v4277_v18 = vld [vmem:[#allocation18_spill] sm:$0xff]  ;;  %v4278_v12 = vld [vmem:[#allocation16_spill] sm:$0xff] }
 0x420   : > { %v2676_v8 = vor.u32 %v4274_v2, %v4273_v9  ;;  %v4275_v13 = vld [vmem:[#allocation41_spill] sm:$0xff]  ;;  %v2680_v20 = vor.u32 %v4278_v12, %v4277_v18  ;;  %v4279_v21 = vld [vmem:[#allocation42_spill] sm:$0xff]  ;;  %v4280_v24 = vld [vmem:[#allocation40_spill] sm:$0xff] }
 0x421   : > { %v2708_v15 = vor.u32 %v4276_v14, %v4275_v13  ;;  %v2712_v26 = vor.u32 %v4280_v24, %v4279_v21  ;;  %v3980_v32 = vld [vmem:[%s4199_s7] ss:$0 sm:$0xff] }
 0x422   : > { %1862 = vmatpush.bf16.msra.mxu0 %v2903_v49  ;;  %3054 = vmatpush.bf16.msra.mxu2 %v2903_v49 }
 0x423   : > { %1911 = vmatpush.bf16.msra.mxu1 %v2911_v55  ;;  %3062 = vmatpush.bf16.msra.mxu3 %v2911_v55 }
 0x426   : > { %1863 = vmatpush.bf16.msra.mxu0 %v2902_v62  ;;  %3055 = vmatpush.bf16.msra.mxu2 %v2902_v62 }
 0x427   : > { %1912 = vmatpush.bf16.msra.mxu1 %v2910_v50  ;;  %3063 = vmatpush.bf16.msra.mxu3 %v2910_v50 }
 0x42a   : > { %1864 = vmatpush.bf16.msra.mxu0 %v2901_v5  ;;  %3056 = vmatpush.bf16.msra.mxu2 %v2901_v5 }
 0x42b   : > { %1913 = vmatpush.bf16.msra.mxu1 %v2909_v4  ;;  %3064 = vmatpush.bf16.msra.mxu3 %v2909_v4 }
 0x42e   : > { %1865 = vmatpush.bf16.msra.mxu0 %v2900_v10  ;;  %3057 = vmatpush.bf16.msra.mxu2 %v2900_v10 }
 0x42f   : > { %1914 = vmatpush.bf16.msra.mxu1 %v2908_v41  ;;  %3065 = vmatpush.bf16.msra.mxu3 %v2908_v41 }
 0x431   : > { %1866 = vmatmul.bf16.vlgmr.msra.gmra.mxu0 %v2652_v54  ;;  %1886 = vmatmul.bf16.vlgmr.msra.gmra.mxu2 %v2684_v47 }
 0x432   : > { %1915 = vmatmul.bf16.vlgmr.msra.gmra.mxu1 %v2656_v60  ;;  %1935 = vmatmul.bf16.vlgmr.msra.gmra.mxu3 %v2688_v16 }
 0x441   : > { %1871 = vmatmul.bf16.gmra.mxu0 %v2660_v25  ;;  %1891 = vmatmul.bf16.gmra.mxu2 %v2692_v35 }
 0x442   : > { %1920 = vmatmul.bf16.gmra.mxu1 %v2664_v17  ;;  %1940 = vmatmul.bf16.gmra.mxu3 %v2696_v51 }
 0x451   : > { %1876 = vmatmul.bf16.gmra.mxu0 %v2668_v58  ;;  %1896 = vmatmul.bf16.gmra.mxu2 %v2700_v57 }
 0x452   : > { %1925 = vmatmul.bf16.gmra.mxu1 %v2672_v1  ;;  %1945 = vmatmul.bf16.gmra.mxu3 %v2704_v3 }
 0x461   : > { %1881 = vmatmul.bf16.gmra.mxu0 %v2676_v8  ;;  %1901 = vmatmul.bf16.gmra.mxu2 %v2708_v15 }
 0x462   : > { %1930 = vmatmul.bf16.gmra.mxu1 %v2680_v20  ;;  %1950 = vmatmul.bf16.gmra.mxu3 %v2712_v26 }
 0x4ae   : > { %v1867_v38 = vpop.f32.mrf.mxu0 }
 0x4af   : > { %v1868_v39 = vadd.f32 %v3980_v32, %v1867_v38  ;;  %v1916_v43 = vpop.f32.mrf.mxu1 }
 0x4b1   : > { %v1917_v44 = vadd.f32 %v1916_v43, %v1868_v39 }
 0x4b3   : > { %v3988_v45 = vsel %vm1958_vm0, %v1917_v44, -inf }
 0x4b4   : > { %v1887_v49 = vpop.f32.mrf.mxu2  ;;  %1975 = vmax.xlane.f32.xlu0 %v3988_v45 }
 0x4b5   : > { %v1888_v55 = vadd.f32 %v3980_v32, %v1887_v49  ;;  %v1936_v62 = vpop.f32.mrf.mxu3 }
 0x4b6   : > { %v1869_v50 = vpop.f32.mrf.mxu0 }
 0x4b7   : > { %v1937_v5 = vadd.f32 %v1936_v62, %v1888_v55  ;;  %v1870_v4 = vadd.f32 %v3980_v32, %v1869_v50  ;;  %v1918_v10 = vpop.f32.mrf.mxu1 }
 0x4b9   : > { %v1919_v41 = vadd.f32 %v1918_v10, %v1870_v4  ;;  %v3995_v46 = vsel %vm1958_vm0, %v1937_v5, -inf }
 0x4ba   : > { %1991 = vmax.xlane.f32.xlu2 %v3995_v46 }
 0x4bb   : > { %v4000_v37 = vsel %vm1958_vm0, %v1919_v41, -inf }
 0x4bc   : > { %v1889_v54 = vpop.f32.mrf.mxu2  ;;  %1977 = vmax.xlane.f32.xlu0 %v4000_v37 }
 0x4bd   : > { %v1890_v0 = vadd.f32 %v3980_v32, %v1889_v54  ;;  %v1938_v19 = vpop.f32.mrf.mxu3 }
 0x4be   : > { %v1872_v47 = vpop.f32.mrf.mxu0 }
 0x4bf   : > { %v1939_v48 = vadd.f32 %v1938_v19, %v1890_v0  ;;  %v1873_v30 = vadd.f32 %v3980_v32, %v1872_v47  ;;  %v1921_v60 = vpop.f32.mrf.mxu1 }
 0x4c1   : > { %v1922_v61 = vadd.f32 %v1921_v60, %v1873_v30  ;;  %v4011_v16 = vsel %vm1958_vm0, %v1939_v48, -inf }
 0x4c3   : > { %v4007_v11 = vsel %vm1958_vm0, %v1922_v61, -inf }
 0x4c4   : > { %v1892_v29 = vpop.f32.mrf.mxu2  ;;  %1979 = vmax.xlane.f32.xlu1 %v4007_v11  ;;  %1993 = vmax.xlane.f32.xlu0 %v4011_v16 }
 0x4c5   : > { %v1893_v28 = vadd.f32 %v3980_v32, %v1892_v29  ;;  %v1941_v25 = vpop.f32.mrf.mxu3 }
 0x4c6   : > { %v1874_v31 = vpop.f32.mrf.mxu0 }
 0x4c7   : > { %v1942_v34 = vadd.f32 %v1941_v25, %v1893_v28  ;;  %v1923_v35 = vpop.f32.mrf.mxu1  ;;  %v1875_v42 = vadd.f32 %v3980_v32, %v1874_v31 }
 0x4c9   : > { %v4018_v36 = vsel %vm1958_vm0, %v1942_v34, -inf  ;;  %v1924_v52 = vadd.f32 %v1923_v35, %v1875_v42 }
 0x4cb   : > { %v4031_v57 = vsel %vm1958_vm0, %v1924_v52, -inf }
 0x4cc   : > { %v1894_v17 = vpop.f32.mrf.mxu2  ;;  %1995 = vmax.xlane.f32.xlu1 %v4018_v36 }
 0x4cd   : > { %v1895_v22 = vadd.f32 %v3980_v32, %v1894_v17  ;;  %v1943_v23 = vpop.f32.mrf.mxu3 }
 0x4ce   : > { %v1877_v51 = vpop.f32.mrf.mxu0 }
 0x4cf   : > { %v1944_v53 = vadd.f32 %v1943_v23, %v1895_v22  ;;  %v1926_v58 = vpop.f32.mrf.mxu1  ;;  %v1878_v59 = vadd.f32 %v3980_v32, %v1877_v51 }
 0x4d1   : > { %v4026_v56 = vsel %vm1958_vm0, %v1944_v53, -inf  ;;  %v1927_v7 = vadd.f32 %v1926_v58, %v1878_v59 }
 0x4d2   : > { %1997 = vmax.xlane.f32.xlu2 %v4026_v56 }
 0x4d3   : > { %v4038_v8 = vsel %vm1958_vm0, %v1927_v7, -inf }
 0x4d4   : > { %v1897_v6 = vpop.f32.mrf.mxu2  ;;  %1981 = vmax.xlane.f32.xlu1 %v4031_v57 }
 0x4d5   : > { %v1898_v1 = vadd.f32 %v3980_v32, %v1897_v6  ;;  %v1946_v40 = vpop.f32.mrf.mxu3 }
 0x4d6   : > { %v1879_v63 = vpop.f32.mrf.mxu0 }
 0x4d7   : > { %v1947_v3 = vadd.f32 %v1946_v40, %v1898_v1  ;;  %v1928_v9 = vpop.f32.mrf.mxu1  ;;  %v1880_v2 = vadd.f32 %v3980_v32, %v1879_v63 }
 0x4d9   : > { %v4042_v13 = vsel %vm1958_vm0, %v1947_v3, -inf  ;;  %v1929_v15 = vadd.f32 %v1928_v9, %v1880_v2 }
 0x4da   : > { %1983 = vmax.xlane.f32.xlu2 %v4038_v8  ;;  %1999 = vmax.xlane.f32.xlu0 %v4042_v13 }
 0x4db   : > { %v4050_v38 = vsel %vm1958_vm0, %v1929_v15, -inf }
 0x4dc   : > { %v1899_v14 = vpop.f32.mrf.mxu2 }
 0x4dd   : > { %v1900_v18 = vadd.f32 %v3980_v32, %v1899_v14  ;;  %v1948_v12 = vpop.f32.mrf.mxu3 }
 0x4de   : > { %v1882_v20 = vpop.f32.mrf.mxu0 }
 0x4df   : > { %v1949_v21 = vadd.f32 %v1948_v12, %v1900_v18  ;;  %v1883_v24 = vadd.f32 %v3980_v32, %v1882_v20  ;;  %v1931_v26 = vpop.f32.mrf.mxu1 }
 0x4e1   : > { %v1932_v27 = vadd.f32 %v1931_v26, %v1883_v24  ;;  %v4054_v39 = vsel %vm1958_vm0, %v1949_v21, -inf }
 0x4e2   : > { %1985 = vmax.xlane.f32.xlu2 %v4050_v38 }
 0x4e3   : > { %v4059_v43 = vsel %vm1958_vm0, %v1932_v27, -inf }
 0x4e4   : > { %v1902_v44 = vpop.f32.mrf.mxu2  ;;  %1987 = vmax.xlane.f32.xlu0 %v4059_v43 }
 0x4e5   : > { %v1903_v49 = vadd.f32 %v3980_v32, %v1902_v44  ;;  %v1951_v55 = vpop.f32.mrf.mxu3 }
 0x4e6   : > { %v1884_v62 = vpop.f32.mrf.mxu0 }
 0x4e7   : > { %v1952_v50 = vadd.f32 %v1951_v55, %v1903_v49  ;;  %v1885_v5 = vadd.f32 %v3980_v32, %v1884_v62  ;;  %v1933_v4 = vpop.f32.mrf.mxu1 }
 0x4e9   : > { %v1934_v10 = vadd.f32 %v1933_v4, %v1885_v5  ;;  %v4066_v41 = vsel %vm1958_vm0, %v1952_v50, -inf }
 0x4ea   : > { %2003 = vmax.xlane.f32.xlu2 %v4066_v41 }
 0x4eb   : > { %v4071_v54 = vsel %vm1958_vm0, %v1934_v10, -inf }
 0x4ec   : > { %v1904_v0 = vpop.f32.mrf.mxu2  ;;  %1989 = vmax.xlane.f32.xlu1 %v4071_v54 }
 0x4ed   : > { %v1905_v19 = vadd.f32 %v3980_v32, %v1904_v0  ;;  %v1953_v47 = vpop.f32.mrf.mxu3 }
 0x4ef   : > { %v1954_v48 = vadd.f32 %v1953_v47, %v1905_v19 }
 0x4f1   : > { %v4077_v30 = vsel %vm1958_vm0, %v1954_v48, -inf }
 0x4f2   : > { %2005 = vmax.xlane.f32.xlu0 %v4077_v30 }
 0x4f4   : > { %2001 = vmax.xlane.f32.xlu1 %v4054_v39 }
 0x527   : > { %v1976_v60 = vpop.xlane.xlu0 %1975 }
 0x528   : > { %v4082_v61 = vsub.f32 %v3988_v45, %v1976_v60 }
 0x52a   : > { %v2023_v29 = vmul.f32 1.442695, %v4082_v61 }
 0x52c   : > { %3108 = vpow2.f32 %v2023_v29 }
 0x52d   : > { %v1992_v28 = vpop.xlane.xlu2 %1991 }
 0x52e   : > { %v4086_v32 = vsub.f32 %v3995_v46, %v1992_v28 }
 0x52f   : > { %v1978_v25 = vpop.xlane.xlu0 %1977 }
 0x530   : > { %v2039_v33 = vmul.f32 1.442695, %v4086_v32  ;;  %v4090_v31 = vsub.f32 %v4000_v37, %v1978_v25 }
 0x532   : > { %v3109_v34 = vpop.eup %3108  ;;  %3110 = vpow2.f32 %v2039_v33  ;;  %v2025_v35 = vmul.f32 1.442695, %v4090_v31 }
 0x533   : > { %2055 = vadd.xlane.f32.xlu1 %v3109_v34 }
 0x534   : > { %3112 = vpow2.f32 %v2025_v35 }
 0x537   : > { %v1980_v45 = vpop.xlane.xlu1 %1979  ;;  %v1994_v42 = vpop.xlane.xlu0 %1993 }
 0x538   : > { %v3111_v17 = vpop.eup %3110  ;;  %v4094_v22 = vsub.f32 %v4007_v11, %v1980_v45  ;;  %v4097_v46 = vsub.f32 %v4011_v16, %v1994_v42 }
 0x539   : > { %2071 = vadd.xlane.f32.xlu0 %v3111_v17 }
 0x53a   : > { %v3113_v23 = vpop.eup %3112  ;;  %v2027_v37 = vmul.f32 1.442695, %v4094_v22  ;;  %v2041_v51 = vmul.f32 1.442695, %v4097_v46 }
 0x53b   : > { %2057 = vadd.xlane.f32.xlu2 %v3113_v23 }
 0x53c   : > { %3114 = vpow2.f32 %v2027_v37 }
 0x53d   : > { %3116 = vpow2.f32 %v2041_v51 }
 0x53f   : > { %v1996_v52 = vpop.xlane.xlu1 %1995 }
 0x540   : > { %v4102_v53 = vsub.f32 %v4018_v36, %v1996_v52 }
 0x542   : > { %v3115_v58 = vpop.eup %3114  ;;  %v2043_v11 = vmul.f32 1.442695, %v4102_v53 }
 0x543   : > { %v3117_v59 = vpop.eup %3116  ;;  %2059 = vadd.xlane.f32.xlu0 %v3115_v58 }
 0x544   : > { %3118 = vpow2.f32 %v2043_v11  ;;  %2073 = vadd.xlane.f32.xlu1 %v3117_v59 }
 0x545   : > { %v1998_v16 = vpop.xlane.xlu2 %1997 }
 0x546   : > { %v4106_v6 = vsub.f32 %v4026_v56, %v1998_v16 }
 0x547   : > { %v1982_v7 = vpop.xlane.xlu1 %1981 }
 0x548   : > { %v2045_v1 = vmul.f32 1.442695, %v4106_v6  ;;  %v4110_v40 = vsub.f32 %v4031_v57, %v1982_v7 }
 0x54a   : > { %v3119_v63 = vpop.eup %3118  ;;  %3120 = vpow2.f32 %v2045_v1  ;;  %v2029_v36 = vmul.f32 1.442695, %v4110_v40 }
 0x54b   : > { %2075 = vadd.xlane.f32.xlu2 %v3119_v63 }
 0x54c   : > { %3122 = vpow2.f32 %v2029_v36 }
 0x54d   : > { %v1984_v3 = vpop.xlane.xlu2 %1983  ;;  %v2000_v9 = vpop.xlane.xlu0 %1999 }
 0x54e   : > { %v4114_v2 = vsub.f32 %v4038_v8, %v1984_v3  ;;  %v4117_v56 = vsub.f32 %v4042_v13, %v2000_v9 }
 0x550   : > { %v3121_v14 = vpop.eup %3120  ;;  %v2031_v15 = vmul.f32 1.442695, %v4114_v2  ;;  %v2047_v57 = vmul.f32 1.442695, %v4117_v56 }
 0x551   : > { %2077 = vadd.xlane.f32.xlu0 %v3121_v14 }
 0x552   : > { %v3123_v18 = vpop.eup %3122  ;;  %3124 = vpow2.f32 %v2031_v15 }
 0x553   : > { %2061 = vadd.xlane.f32.xlu1 %v3123_v18  ;;  %3126 = vpow2.f32 %v2047_v57 }
 0x555   : > { %v1986_v12 = vpop.xlane.xlu2 %1985 }
 0x556   : > { %v4122_v20 = vsub.f32 %v4050_v38, %v1986_v12 }
 0x557   : > { %v1988_v21 = vpop.xlane.xlu0 %1987 }
 0x558   : > { %v3125_v8 = vpop.eup %3124  ;;  %v2033_v24 = vmul.f32 1.442695, %v4122_v20  ;;  %v4126_v13 = vsub.f32 %v4059_v43, %v1988_v21 }
 0x559   : > { %2063 = vadd.xlane.f32.xlu2 %v3125_v8  ;;  %v3127_v26 = vpop.eup %3126 }
 0x55a   : > { %3128 = vpow2.f32 %v2033_v24  ;;  %v2035_v27 = vmul.f32 1.442695, %v4126_v13 }
 0x55b   : > { %2079 = vadd.xlane.f32.xlu1 %v3127_v26 }
 0x55c   : > { %3130 = vpow2.f32 %v2035_v27 }
 0x55d   : > { %v2004_v44 = vpop.xlane.xlu2 %2003 }
 0x55e   : > { %v4130_v49 = vsub.f32 %v4066_v41, %v2004_v44 }
 0x55f   : > { %v1990_v38 = vpop.xlane.xlu1 %1989 }
 0x560   : > { %v3129_v55 = vpop.eup %3128  ;;  %v2051_v62 = vmul.f32 1.442695, %v4130_v49  ;;  %v4134_v50 = vsub.f32 %v4071_v54, %v1990_v38 }
 0x561   : > { %2065 = vadd.xlane.f32.xlu0 %v3129_v55 }
 0x562   : > { %v3131_v43 = vpop.eup %3130  ;;  %3132 = vpow2.f32 %v2051_v62  ;;  %v2037_v5 = vmul.f32 1.442695, %v4134_v50 }
 0x563   : > { %2067 = vadd.xlane.f32.xlu1 %v3131_v43 }
 0x564   : > { %3134 = vpow2.f32 %v2037_v5 }
 0x565   : > { %v2006_v4 = vpop.xlane.xlu0 %2005 }
 0x566   : > { %v4138_v10 = vsub.f32 %v4077_v30, %v2006_v4 }
 0x567   : > { %v2002_v41 = vpop.xlane.xlu1 %2001 }
 0x568   : > { %v3133_v0 = vpop.eup %3132  ;;  %v2053_v19 = vmul.f32 1.442695, %v4138_v10  ;;  %v4142_v47 = vsub.f32 %v4054_v39, %v2002_v41 }
 0x569   : > { %2083 = vadd.xlane.f32.xlu0 %v3133_v0 }
 0x56a   : > { %v3135_v54 = vpop.eup %3134  ;;  %3136 = vpow2.f32 %v2053_v19  ;;  %v2049_v48 = vmul.f32 1.442695, %v4142_v47 }
 0x56b   : > { %2069 = vadd.xlane.f32.xlu2 %v3135_v54 }
 0x56c   : > { %3138 = vpow2.f32 %v2049_v48 }
 0x570   : > { %v3137_v60 = vpop.eup %3136 }
 0x571   : > { %2085 = vadd.xlane.f32.xlu1 %v3137_v60 }
 0x572   : > { %v3139_v29 = vpop.eup %3138 }
 0x573   : > { %2081 = vadd.xlane.f32.xlu2 %v3139_v29 }
 0x5a6   : > { %v2056_v30 = vpop.xlane.xlu1 %2055 }
 0x5a7   : > { %3140 = vlog2.f32 %v2056_v30 }
 0x5ac   : > { %v2072_v28 = vpop.xlane.xlu0 %2071 }
 0x5ad   : > { %v3141_v25 = vpop.eup %3140  ;;  %3142 = vlog2.f32 %v2072_v28 }
 0x5ae   : > { %v2088_v39 = vmul.f32 0.6931472, %v3141_v25  ;;  %v2058_v33 = vpop.xlane.xlu2 %2057 }
 0x5af   : > { %3144 = vlog2.f32 %v2058_v33 }
 0x5b0   : > { %v2119_v34 = vsub.f32 %v4082_v61, %v2088_v39 }
 0x5b2   : > { %2135 = vst [vmem:[%s3357_s21] sm:$0xff] %v2119_v34 }
 0x5b3   : > { %v3143_v35 = vpop.eup %3142 }
 0x5b4   : > { %v2104_v45 = vmul.f32 0.6931472, %v3143_v35 }
 0x5b5   : > { %v3145_v42 = vpop.eup %3144 }
 0x5b6   : > { %v2127_v17 = vsub.f32 %v4086_v32, %v2104_v45  ;;  %v2090_v23 = vmul.f32 0.6931472, %v3145_v42  ;;  %v2060_v37 = vpop.xlane.xlu0 %2059 }
 0x5b7   : > { %v2074_v51 = vpop.xlane.xlu1 %2073  ;;  %3146 = vlog2.f32 %v2060_v37 }
 0x5b8   : > { %2143 = vst [vmem:[%s3357_s21 + $0x40] sm:$0xff] %v2127_v17  ;;  %v2120_v52 = vsub.f32 %v4090_v31, %v2090_v23  ;;  %3148 = vlog2.f32 %v2074_v51 }
 0x5ba   : > { %2136 = vst [vmem:[%s3357_s21 + $0x8] sm:$0xff] %v2120_v52 }
 0x5bd   : > { %v3147_v58 = vpop.eup %3146 }
 0x5be   : > { %v3149_v11 = vpop.eup %3148  ;;  %v2092_v61 = vmul.f32 0.6931472, %v3147_v58  ;;  %v2076_v59 = vpop.xlane.xlu2 %2075 }
 0x5bf   : > { %v2106_v16 = vmul.f32 0.6931472, %v3149_v11  ;;  %3150 = vlog2.f32 %v2076_v59 }
 0x5c0   : > { %v2121_v32 = vsub.f32 %v4094_v22, %v2092_v61 }
 0x5c1   : > { %v2128_v7 = vsub.f32 %v4097_v46, %v2106_v16 }
 0x5c2   : > { %2137 = vst [vmem:[%s3357_s21 + $0x10] sm:$0xff] %v2121_v32 }
 0x5c3   : > { %2144 = vst [vmem:[%s3357_s21 + $0x48] sm:$0xff] %v2128_v7 }
 0x5c4   : > { %v2078_v1 = vpop.xlane.xlu0 %2077 }
 0x5c5   : > { %v3151_v63 = vpop.eup %3150  ;;  %3152 = vlog2.f32 %v2078_v1 }
 0x5c6   : > { %v2108_v31 = vmul.f32 0.6931472, %v3151_v63  ;;  %v2062_v36 = vpop.xlane.xlu1 %2061 }
 0x5c7   : > { %3154 = vlog2.f32 %v2062_v36 }
 0x5c8   : > { %v2129_v3 = vsub.f32 %v4102_v53, %v2108_v31 }
 0x5ca   : > { %2145 = vst [vmem:[%s3357_s21 + $0x50] sm:$0xff] %v2129_v3 }
 0x5cb   : > { %v3153_v9 = vpop.eup %3152 }
 0x5cc   : > { %v2110_v14 = vmul.f32 0.6931472, %v3153_v9  ;;  %v2064_v15 = vpop.xlane.xlu2 %2063 }
 0x5cd   : > { %v3155_v57 = vpop.eup %3154  ;;  %3156 = vlog2.f32 %v2064_v15 }
 0x5ce   : > { %v2130_v22 = vsub.f32 %v4106_v6, %v2110_v14  ;;  %v2094_v46 = vmul.f32 0.6931472, %v3155_v57  ;;  %v2080_v18 = vpop.xlane.xlu1 %2079 }
 0x5cf   : > { %3158 = vlog2.f32 %v2080_v18 }
 0x5d0   : > { %2146 = vst [vmem:[%s3357_s21 + $0x58] sm:$0xff] %v2130_v22  ;;  %v2122_v12 = vsub.f32 %v4110_v40, %v2094_v46 }
 0x5d2   : > { %2138 = vst [vmem:[%s3357_s21 + $0x18] sm:$0xff] %v2122_v12 }
 0x5d3   : > { %v3157_v21 = vpop.eup %3156 }
 0x5d4   : > { %v2096_v8 = vmul.f32 0.6931472, %v3157_v21  ;;  %v2066_v53 = vpop.xlane.xlu0 %2065 }
 0x5d5   : > { %v3159_v24 = vpop.eup %3158  ;;  %3160 = vlog2.f32 %v2066_v53 }
 0x5d6   : > { %v2123_v26 = vsub.f32 %v4114_v2, %v2096_v8  ;;  %v2112_v27 = vmul.f32 0.6931472, %v3159_v24  ;;  %v2068_v44 = vpop.xlane.xlu1 %2067 }
 0x5d7   : > { %3162 = vlog2.f32 %v2068_v44 }
 0x5d8   : > { %2139 = vst [vmem:[%s3357_s21 + $0x20] sm:$0xff] %v2123_v26  ;;  %v2131_v6 = vsub.f32 %v4117_v56, %v2112_v27 }
 0x5da   : > { %2147 = vst [vmem:[%s3357_s21 + $0x60] sm:$0xff] %v2131_v6 }
 0x5db   : > { %v3161_v38 = vpop.eup %3160 }
 0x5dc   : > { %v2098_v55 = vmul.f32 0.6931472, %v3161_v38  ;;  %v2084_v40 = vpop.xlane.xlu0 %2083 }
 0x5dd   : > { %v3163_v62 = vpop.eup %3162  ;;  %3164 = vlog2.f32 %v2084_v40 }
 0x5de   : > { %v2124_v43 = vsub.f32 %v4122_v20, %v2098_v55  ;;  %v2100_v5 = vmul.f32 0.6931472, %v3163_v62  ;;  %v2070_v4 = vpop.xlane.xlu2 %2069 }
 0x5df   : > { %3166 = vlog2.f32 %v2070_v4 }
 0x5e0   : > { %2140 = vst [vmem:[%s3357_s21 + $0x28] sm:$0xff] %v2124_v43  ;;  %v2125_v2 = vsub.f32 %v4126_v13, %v2100_v5 }
 0x5e2   : > { %2141 = vst [vmem:[%s3357_s21 + $0x30] sm:$0xff] %v2125_v2 }
 0x5e3   : > { %v3165_v41 = vpop.eup %3164 }
 0x5e4   : > { %v2116_v0 = vmul.f32 0.6931472, %v3165_v41  ;;  %v2086_v56 = vpop.xlane.xlu1 %2085 }
 0x5e5   : > { %v3167_v19 = vpop.eup %3166  ;;  %3168 = vlog2.f32 %v2086_v56 }
 0x5e6   : > { %v2133_v54 = vsub.f32 %v4130_v49, %v2116_v0  ;;  %v2102_v48 = vmul.f32 0.6931472, %v3167_v19  ;;  %v2082_v20 = vpop.xlane.xlu2 %2081 }
 0x5e7   : > { %3170 = vlog2.f32 %v2082_v20 }
 0x5e8   : > { %2149 = vst [vmem:[%s3357_s21 + $0x70] sm:$0xff] %v2133_v54  ;;  %v2126_v60 = vsub.f32 %v4134_v50, %v2102_v48 }
 0x5ea   : > { %2142 = vst [vmem:[%s3357_s21 + $0x38] sm:$0xff] %v2126_v60 }
 0x5eb   : > { %v3169_v29 = vpop.eup %3168 }
 0x5ec   : > { %v2118_v30 = vmul.f32 0.6931472, %v3169_v29 }
 0x5ed   : > { %v3171_v13 = vpop.eup %3170 }
 0x5ee   : > { %v2134_v28 = vsub.f32 %v4138_v10, %v2118_v30  ;;  %v2114_v25 = vmul.f32 0.6931472, %v3171_v13 }
 0x5f0   : > { %2150 = vst [vmem:[%s3357_s21 + $0x78] sm:$0xff] %v2134_v28  ;;  %v2132_v39 = vsub.f32 %v4142_v47, %v2114_v25 }
 0x5f2   : > { %2148 = vst [vmem:[%s3357_s21 + $0x68] sm:$0xff] %v2132_v39 }
 0x5f3 PF: > { %s18_s9 = sadd.s32 1, %s3210_s9   ;;  %s4281_s27 = smov %s3202_s29 }
 0x5f4   : > { %p15_p10 = scmp.ge.s32.totalorder %s18_s9, 8   ;;  %s4282_s28 = smov %s3206_s30 }
 0x5f5   : > { %s4283_s29 = smov %s4286_s10  ;;  %s4284_s30 = smov %s4290_s11 }
 0x5f6   :  { %17 = sbr.rel (!%p15_p10) target bundleno = 3 (0x3), region = 94 }

</bundles_post_ra>
